<compile_context>
chip_gen: v7x
topology: tpu7x:2x2x1
jax: 0.10.0
libtpu: 0.0.40
codegen_flags: <defaults>
</compile_context>

<pallas_src>
import functools

import jax
import jax.numpy as jnp
from jax.experimental import pallas as pl
from jax.experimental.pallas import tpu as pltpu


# ----------------------------- hw-aware helpers -----------------------------

def _round_up(x, m):
    return (x + m - 1) // m * m


@functools.lru_cache(maxsize=1)
def _device_kind():
    try:
        return jax.devices()[0].device_kind.lower()
    except Exception:
        return ''


@functools.lru_cache(maxsize=1)
def _vmem_limit():
    """Generation-aware scoped-VMEM budget (~3/4 of physical, clamped)."""
    cap = None
    try:
        cap = getattr(pltpu.get_tpu_info(), 'vmem_capacity_bytes', None)
    except Exception:
        cap = None
    if not cap:
        cap = 64 * 1024 * 1024
    return int(min(max(cap * 3 // 4, 32 * 1024 * 1024), 100 * 1024 * 1024))


@functools.lru_cache(maxsize=1)
def _m_target():
    """MXU M-dim packing target so the weight stream is not the bottleneck."""
    kind = _device_kind()
    if 'v6' in kind:
        return 1024
    return 512            # v5e, and per-TC on v7x


@functools.lru_cache(maxsize=1)
def _min_batch_blocks():
    """v7x has 2 TensorCores: keep >=2 batch blocks so 'parallel' axis shards."""
    return 2 if 'v7' in _device_kind() else 1


def _pick_rows_block(batch, rows, target, min_blocks=1):
    """Largest divisor Bb of batch with Bb*rows ~>= target and batch//Bb >= min_blocks."""
    want = max(1, min(batch, -(-target // rows)))
    if min_blocks > 1:
        want = min(want, max(1, batch // min_blocks))
    while batch % want:
        want -= 1
    return want


def _pick_vocab_tile(vp, cap=2048):
    if vp <= cap:
        return vp
    for t in (2048, 1024, 512, 256, 128):
        if vp % t == 0:
            return t
    return vp


def _layernorm(x, w, b, eps=1e-5):
    mu = jnp.mean(x, axis=-1, keepdims=True)
    xc = x - mu
    var = jnp.mean(xc * xc, axis=-1, keepdims=True)
    return xc * jax.lax.rsqrt(var + eps) * w + b


# ----------------------------- kernels -----------------------------

def gpt_blocks_kernel(x_ref, ln1w, ln1b, wqkv, bqkv, wo, bo,
                      ln2w, ln2b, wfc, bfc, wpr, bpr, lnfw, lnfb,
                      h_ref, mask_ref, attno_ref, *, n_head):
    """All transformer blocks, one layer per grid step along axis 1.

    h_ref is the same output block for every layer step of a given batch block
    -> it stays resident in VMEM and acts as the running activation.  The
    final LayerNorm (ln_f) is fused into the last layer step so the head
    kernel never recomputes it per vocab tile.
    """
    layer = pl.program_id(1)
    n_layers = pl.num_programs(1)

    Bb, T, D = h_ref.shape
    hd = D // n_head
    scale = 1.0 / float(hd) ** 0.5
    M = Bb * T

    @pl.when(layer == 0)
    def _():
        h_ref[...] = x_ref[...]                       # load embeddings once
        row = jax.lax.broadcasted_iota(jnp.int32, (T, T), 0)
        col = jax.lax.broadcasted_iota(jnp.int32, (T, T), 1)
        mask_ref[...] = jnp.where(col <= row, 0.0, -1e30).astype(jnp.float32)

    x = h_ref[...].reshape(M, D)                      # (M, D) f32, flattened rows

    # ---- causal multi-head self-attention ----
    h1 = _layernorm(x, ln1w[...], ln1b[...])          # f32
    qkv = jnp.dot(h1.astype(jnp.bfloat16), wqkv[...],
                  preferred_element_type=jnp.float32) + bqkv[...]
    qkv3 = qkv.astype(jnp.bfloat16).reshape(Bb, T, 3 * D)   # single bf16 cast
    q_all = qkv3[:, :, :D]
    k_all = qkv3[:, :, D:2 * D]
    v_all = qkv3[:, :, 2 * D:]

    bias = mask_ref[...][None]                        # (1, T, T) additive causal bias

    # TODO(synk): per-head slices are hd (<128) lanes wide; a 128-aligned
    # head-group layout would remove the masked loads/stores on real sizes.
    for hix in range(n_head):                         # static loop; Bb-batched einsums
        lo = hix * hd
        q = q_all[:, :, lo:lo + hd]
        k = k_all[:, :, lo:lo + hd]
        v = v_all[:, :, lo:lo + hd]
        att = jnp.einsum('btd,bsd->bts', q, k,
                         preferred_element_type=jnp.float32) * scale + bias
        att = att - att.max(axis=-1, keepdims=True)
        p = jnp.exp(att)                              # f32
        p = p * pl.reciprocal(p.sum(axis=-1, keepdims=True), approx=True)
        o = jnp.einsum('bts,bsd->btd', p.astype(jnp.bfloat16), v,
                       preferred_element_type=jnp.float32)
        attno_ref[:, lo:lo + hd] = o.reshape(M, hd).astype(jnp.bfloat16)

    # single full-K output projection (instead of n_head shallow-K matmuls)
    y = jnp.dot(attno_ref[...], wo[...], preferred_element_type=jnp.float32)
    x = x + y + bo[...]

    # ---- MLP ----
    # TODO(synk): for v7x (64 MiB VMEM) at large D the 4D FFN weights should be
    # tiled over an inner pipeline instead of being resident per layer step.
    h2 = _layernorm(x, ln2w[...], ln2b[...])
    h2 = jnp.dot(h2.astype(jnp.bfloat16), wfc[...],
                 preferred_element_type=jnp.float32) + bfc[...]
    # TODO(synk): nn.GELU() default is the exact erf form; tanh approximation is
    # used here for guaranteed Mosaic lowering (differs by ~1e-3).
    h2 = jax.nn.gelu(h2, approximate=True)
    h2 = jnp.dot(h2.astype(jnp.bfloat16), wpr[...],
                 preferred_element_type=jnp.float32) + bpr[...]
    out = x + h2

    @pl.when(layer < n_layers - 1)
    def _():
        h_ref[...] = out.reshape(h_ref.shape)

    @pl.when(layer == n_layers - 1)
    def _():
        # fuse the final LayerNorm into the last layer step
        h_ref[...] = _layernorm(out, lnfw[...], lnfb[...]).reshape(h_ref.shape)


def gpt_head_kernel(x_ref, wh, o_ref):
    """Vocab projection (no bias) of the already-ln_f'd activations."""
    Bb, T, D = x_ref.shape
    x = x_ref[...].reshape(Bb * T, D).astype(jnp.bfloat16)
    o_ref[...] = jnp.dot(x, wh[...],
                         preferred_element_type=jnp.float32).reshape(o_ref.shape)


# ----------------------------- pallas wrappers -----------------------------

_BLOCK_WEIGHT_NAMES = ('ln1_w', 'ln1_b', 'w_qkv', 'b_qkv', 'w_proj', 'b_proj',
                       'ln2_w', 'ln2_b', 'w_fc', 'b_fc', 'w_fc2', 'b_fc2')


def run_blocks(h, params, n_head):
    B, T, D = h.shape
    n_layer = params['w_qkv'].shape[0]
    Bb = _pick_rows_block(B, T, target=_m_target(), min_blocks=_min_batch_blocks())

    weights = [params[n] for n in _BLOCK_WEIGHT_NAMES]

    def wspec(w):                                     # per-layer weight (leading layer axis)
        shp = tuple(w.shape[1:])
        return pl.BlockSpec((None,) + shp,
                            lambda b, l, _n=len(shp): (l,) + (0,) * _n)

    def fspec(w):                                     # layer-invariant param (ln_f)
        shp = tuple(w.shape)
        return pl.BlockSpec(shp, lambda b, l, _n=len(shp): (0,) * _n)

    in_specs = ([pl.BlockSpec((Bb, T, D), lambda b, l: (b, 0, 0))]
                + [wspec(w) for w in weights]
                + [fspec(params['ln_f_w']), fspec(params['ln_f_b'])])

    return pl.pallas_call(
        functools.partial(gpt_blocks_kernel, n_head=n_head),
        out_shape=jax.ShapeDtypeStruct((B, T, D), jnp.float32),
        grid=(B // Bb, n_layer),
        in_specs=in_specs,
        out_specs=pl.BlockSpec((Bb, T, D), lambda b, l: (b, 0, 0)),
        scratch_shapes=[pltpu.VMEM((T, T), jnp.float32),          # additive causal bias
                        pltpu.VMEM((Bb * T, D), jnp.bfloat16)],   # per-head attn outputs
        input_output_aliases={0: 0},                  # embeddings buffer reused for output
        compiler_params=pltpu.CompilerParams(
            dimension_semantics=("parallel", "arbitrary"),
            vmem_limit_bytes=_vmem_limit()),
    )(h, *weights, params['ln_f_w'], params['ln_f_b'])


def run_head(h, head_w):
    B, T, D = h.shape
    Vp = head_w.shape[1]                              # padded to a multiple of the tile
    tile_v = _pick_vocab_tile(Vp)
    Bb = _pick_rows_block(B, T, target=_m_target(), min_blocks=_min_batch_blocks())

    in_specs = [
        pl.BlockSpec((Bb, T, D), lambda b, v: (b, 0, 0)),
        pl.BlockSpec((D, tile_v), lambda b, v: (0, v)),
    ]
    return pl.pallas_call(
        gpt_head_kernel,
        out_shape=jax.ShapeDtypeStruct((B, T, Vp), jnp.float32),
        grid=(B // Bb, Vp // tile_v),
        in_specs=in_specs,
        out_specs=pl.BlockSpec((Bb, T, tile_v), lambda b, v: (b, 0, v)),
        compiler_params=pltpu.CompilerParams(
            dimension_semantics=("parallel", "parallel"),
            vmem_limit_bytes=_vmem_limit()),
    )(h, head_w)


# ----------------------------- model glue -----------------------------

def init_params(key, vocab_size, block_size, n_layer, n_head, n_embd):
    keys = jax.random.split(key, 3 + n_layer)

    def normal(k, shape, std=0.02, dtype=jnp.float32):
        return (std * jax.random.normal(k, shape)).astype(dtype)

    # Pad vocab up to the head tile so every store is a full lane-dense tile.
    v128 = _round_up(vocab_size, 128)
    vocab_pad = v128 if v128 <= 2048 else _round_up(vocab_size, 2048)
    head_w = jnp.pad(normal(keys[2], (n_embd, vocab_size)),
                     ((0, 0), (0, vocab_pad - vocab_size))).astype(jnp.bfloat16)

    bk = [jax.random.split(keys[3 + li], 4) for li in range(n_layer)]
    bf16 = jnp.bfloat16
    params = {
        'tok_emb': normal(keys[0], (vocab_size, n_embd)),
        'pos_emb': normal(keys[1], (block_size, n_embd)),
        'ln_f_w': jnp.ones((1, n_embd), jnp.float32),
        'ln_f_b': jnp.zeros((1, n_embd), jnp.float32),
        'head_w': head_w,                             # nn.Linear(..., bias=False)
        # per-layer weights stacked on a leading layer axis (bf16 matmul weights,
        # f32 biases / LayerNorm params); w_proj stored dense (L, D, D).
        'ln1_w': jnp.ones((n_layer, 1, n_embd), jnp.float32),
        'ln1_b': jnp.zeros((n_layer, 1, n_embd), jnp.float32),
        'w_qkv': jnp.stack([normal(bk[l][0], (n_embd, 3 * n_embd), dtype=bf16)
                            for l in range(n_layer)]),
        'b_qkv': jnp.zeros((n_layer, 1, 3 * n_embd), jnp.float32),
        'w_proj': jnp.stack([normal(bk[l][1], (n_embd, n_embd), dtype=bf16)
                             for l in range(n_layer)]),
        'b_proj': jnp.zeros((n_layer, 1, n_embd), jnp.float32),
        'ln2_w': jnp.ones((n_layer, 1, n_embd), jnp.float32),
        'ln2_b': jnp.zeros((n_layer, 1, n_embd), jnp.float32),
        'w_fc': jnp.stack([normal(bk[l][2], (n_embd, 4 * n_embd), dtype=bf16)
                           for l in range(n_layer)]),
        'b_fc': jnp.zeros((n_layer, 1, 4 * n_embd), jnp.float32),
        'w_fc2': jnp.stack([normal(bk[l][3], (4 * n_embd, n_embd), dtype=bf16)
                            for l in range(n_layer)]),
        'b_fc2': jnp.zeros((n_layer, 1, n_embd), jnp.float32),
    }
    return params


def gpt_decoder_forward(params, x_tokens, c_embed, *, n_head, vocab_size, block_size):
    """Mirrors GPTDecoder.forward(x, c) -> (logits, target)."""
    idx = x_tokens[:, :-1]                                  # drop last token
    tok = jnp.take(params['tok_emb'], idx, axis=0)          # (B, S-1, D)
    h = jnp.concatenate([c_embed, tok], axis=1)             # prepend conditioning
    B, T, D = h.shape
    assert T <= block_size, "conditioning + sequence exceeds block_size"
    h = h + params['pos_emb'][None, :T, :]                  # position embeddings
    # embd_pdrop = 0.0 -> identity

    Tp = _round_up(T, 16)                                   # full bf16 sublane packing
    if Tp != T:
        h = jnp.pad(h, ((0, 0), (0, Tp - T), (0, 0)))       # padded keys are causally masked
    h = run_blocks(h, params, n_head)                       # all layers (+ ln_f) in one call

    cond_size = c_embed.shape[-2]
    hr = h[:, cond_size - 1:T, :]                           # drop cond rows BEFORE the head
    S = hr.shape[1]
    Sp = _round_up(S, 16)
    if Sp != S:
        hr = jnp.pad(hr, ((0, 0), (0, Sp - S), (0, 0)))
    logits = run_head(hr, params['head_w'])                 # (B, Sp, Vpad)
    logits = logits[:, :S, :vocab_size]
    return logits, x_tokens


gpt_decoder_forward_jit = jax.jit(
    gpt_decoder_forward, static_argnames=('n_head', 'vocab_size', 'block_size'))


# ----------------------------- main -----------------------------

if __name__ == "__main__":
    # Small GPT config (args.vocab_size etc.)
    vocab_size = 16
    block_size = 16
    n_layer = 2
    n_head = 4
    n_embd = 32

    B, S, Tc = 2, 8, 4   # batch, token sequence length, conditioning length

    root = jax.random.PRNGKey(0)
    k_params, k_x, k_c = jax.random.split(root, 3)

    params = init_params(k_params, vocab_size, block_size, n_layer, n_head, n_embd)
    x_tokens = jax.random.randint(k_x, (B, S), 0, vocab_size, dtype=jnp.int32)
    c_embed = (0.02 * jax.random.normal(k_c, (B, Tc, n_embd))).astype(jnp.float32)

    logits, target = gpt_decoder_forward_jit(
        params, x_tokens, c_embed,
        n_head=n_head, vocab_size=vocab_size, block_size=block_size)
    jax.block_until_ready(logits)
    jax.block_until_ready(target)

    assert logits.shape == (B, S, vocab_size), logits.shape
    assert target.shape == (B, S), target.shape
    print("KERNEL_OK")
</pallas_src>

<mosaic_0001>
module attributes {stable_mosaic.version = 11 : i64} {
  func.func @gpt_head_kernel(%arg0: i32, %arg1: i32, %arg2: memref<2x16x32xf32, #tpu.memory_space<vmem>>, %arg3: memref<32x128xbf16, #tpu.memory_space<vmem>>, %arg4: memref<2x16x128xf32, #tpu.memory_space<vmem>>) attributes {dimension_semantics = [#tpu.dimension_semantics<parallel>, #tpu.dimension_semantics<parallel>], iteration_bounds = array<i64: 1, 1>, scalar_prefetch = 0 : i64, scratch_operands = 0 : i64, tpu.core_type = #tpu.core_type<tc>, window_params = [{transform_indices = @transform_0, window_bounds = array<i64: 2, 16, 32>}, {transform_indices = @transform_1, window_bounds = array<i64: 32, 128>}, {transform_indices = @transform_2, window_bounds = array<i64: 2, 16, 128>}]} {
    %c0 = arith.constant 0 : index
    %c0_0 = arith.constant 0 : index
    %c0_1 = arith.constant 0 : index
    %0 = vector.load %arg2[%c0, %c0_0, %c0_1] : memref<2x16x32xf32, #tpu.memory_space<vmem>>, vector<2x16x32xf32>
    %1 = vector.shape_cast %0 : vector<2x16x32xf32> to vector<32x32xf32>
    %2 = arith.truncf %1 : vector<32x32xf32> to vector<32x32xbf16>
    %c0_2 = arith.constant 0 : index
    %c0_3 = arith.constant 0 : index
    %3 = vector.load %arg3[%c0_2, %c0_3] : memref<32x128xbf16, #tpu.memory_space<vmem>>, vector<32x128xbf16>
    %cst = arith.constant dense<0.000000e+00> : vector<32x128xf32>
    %4 = tpu.matmul %2, %3, %cst {dimension_numbers = #tpu.dot_dimension_numbers<[1], [0], [0], [1], [0, 0, 1, 1], [], []>} : vector<32x32xbf16>, vector<32x128xbf16>, vector<32x128xf32> -> vector<32x128xf32>
    %5 = vector.shape_cast %4 : vector<32x128xf32> to vector<2x16x128xf32>
    %c0_4 = arith.constant 0 : index
    %c0_5 = arith.constant 0 : index
    %c0_6 = arith.constant 0 : index
    %6 = vector.load %arg4[%c0_4, %c0_5, %c0_6] : memref<2x16x128xf32, #tpu.memory_space<vmem>>, vector<2x16x128xf32>
    tpu.vector_store %arg4[%c0_4, %c0_5, %c0_6], %5 {strides = array<i32>} : memref<2x16x128xf32, #tpu.memory_space<vmem>>, vector<2x16x128xf32>,
    return
  }
  func.func @transform_0(%arg0: i32, %arg1: i32) -> (i32, i32, i32) {
    %c0_i32 = arith.constant 0 : i32
    %c0_i32_0 = arith.constant 0 : i32
    %c0_i32_1 = arith.constant 0 : i32
    return %arg0, %c0_i32, %c0_i32_0 : i32, i32, i32
  }
  func.func @transform_1(%arg0: i32, %arg1: i32) -> (i32, i32) {
    %c0_i32 = arith.constant 0 : i32
    %c0_i32_0 = arith.constant 0 : i32
    return %c0_i32, %arg1 : i32, i32
  }
  func.func @transform_2(%arg0: i32, %arg1: i32) -> (i32, i32, i32) {
    %c0_i32 = arith.constant 0 : i32
    %c0_i32_0 = arith.constant 0 : i32
    return %arg0, %c0_i32, %arg1 : i32, i32, i32
  }
}

module attributes {stable_mosaic.version = 11 : i64} {
  func.func @gpt_blocks_kernel(%arg0: i32, %arg1: i32, %arg2: memref<2x16x32xf32, #tpu.memory_space<vmem>>, %arg3: memref<1x1x32xf32, #tpu.memory_space<vmem>>, %arg4: memref<1x1x32xf32, #tpu.memory_space<vmem>>, %arg5: memref<1x32x96xbf16, #tpu.memory_space<vmem>>, %arg6: memref<1x1x96xf32, #tpu.memory_space<vmem>>, %arg7: memref<1x32x32xbf16, #tpu.memory_space<vmem>>, %arg8: memref<1x1x32xf32, #tpu.memory_space<vmem>>, %arg9: memref<1x1x32xf32, #tpu.memory_space<vmem>>, %arg10: memref<1x1x32xf32, #tpu.memory_space<vmem>>, %arg11: memref<1x32x128xbf16, #tpu.memory_space<vmem>>, %arg12: memref<1x1x128xf32, #tpu.memory_space<vmem>>, %arg13: memref<1x128x32xbf16, #tpu.memory_space<vmem>>, %arg14: memref<1x1x32xf32, #tpu.memory_space<vmem>>, %arg15: memref<1x32xf32, #tpu.memory_space<vmem>>, %arg16: memref<1x32xf32, #tpu.memory_space<vmem>>, %arg17: memref<2x16x32xf32, #tpu.memory_space<vmem>>, %arg18: memref<16x16xf32, #tpu.memory_space<vmem>>, %arg19: memref<32x32xbf16, #tpu.memory_space<vmem>>) attributes {dimension_semantics = [#tpu.dimension_semantics<parallel>, #tpu.dimension_semantics<arbitrary>], iteration_bounds = array<i64: 1, 2>, scalar_prefetch = 0 : i64, scratch_operands = 2 : i64, tpu.core_type = #tpu.core_type<tc>, window_params = [{transform_indices = @transform_0, window_bounds = array<i64: 2, 16, 32>}, {transform_indices = @transform_1, window_bounds = array<i64: 1, 1, 32>}, {transform_indices = @transform_2, window_bounds = array<i64: 1, 1, 32>}, {transform_indices = @transform_3, window_bounds = array<i64: 1, 32, 96>}, {transform_indices = @transform_4, window_bounds = array<i64: 1, 1, 96>}, {transform_indices = @transform_5, window_bounds = array<i64: 1, 32, 32>}, {transform_indices = @transform_6, window_bounds = array<i64: 1, 1, 32>}, {transform_indices = @transform_7, window_bounds = array<i64: 1, 1, 32>}, {transform_indices = @transform_8, window_bounds = array<i64: 1, 1, 32>}, {transform_indices = @transform_9, window_bounds = array<i64: 1, 32, 128>}, {transform_indices = @transform_10, window_bounds = array<i64: 1, 1, 128>}, {transform_indices = @transform_11, window_bounds = array<i64: 1, 128, 32>}, {transform_indices = @transform_12, window_bounds = array<i64: 1, 1, 32>}, {pipeline_mode = #tpu.pipeline_mode<synchronous>, transform_indices = @transform_13, window_bounds = array<i64: 1, 32>}, {pipeline_mode = #tpu.pipeline_mode<synchronous>, transform_indices = @transform_14, window_bounds = array<i64: 1, 32>}, {transform_indices = @transform_15, window_bounds = array<i64: 2, 16, 32>}]} {
    %c0_i32 = arith.constant 0 : i32
    %0 = arith.cmpi eq, %arg1, %c0_i32 : i32
    %1 = arith.extui %0 : i1 to i32
    %c0_i32_0 = arith.constant 0 : i32
    %2 = arith.cmpi ne, %1, %c0_i32_0 : i32
    scf.if %2 {
      %c0_88 = arith.constant 0 : index
      %c0_89 = arith.constant 0 : index
      %c0_90 = arith.constant 0 : index
      %205 = vector.load %arg2[%c0_88, %c0_89, %c0_90] : memref<2x16x32xf32, #tpu.memory_space<vmem>>, vector<2x16x32xf32>
      %c0_91 = arith.constant 0 : index
      %c0_92 = arith.constant 0 : index
      %c0_93 = arith.constant 0 : index
      %206 = vector.load %arg17[%c0_91, %c0_92, %c0_93] : memref<2x16x32xf32, #tpu.memory_space<vmem>>, vector<2x16x32xf32>
      tpu.vector_store %arg17[%c0_91, %c0_92, %c0_93], %205 {strides = array<i32>} : memref<2x16x32xf32, #tpu.memory_space<vmem>>, vector<2x16x32xf32>,
      %207 = tpu.iota {dimensions = array<i32: 0>} : vector<16x16xi32>
      %208 = tpu.iota {dimensions = array<i32: 1>} : vector<16x16xi32>
      %209 = arith.cmpi sle, %208, %207 : vector<16x16xi32>
      %cst_94 = arith.constant 0.000000e+00 : f32
      %cst_95 = arith.constant -1.000000e+30 : f32
      %210 = vector.broadcast %cst_94 : f32 to vector<16x16xf32>
      %211 = vector.broadcast %cst_95 : f32 to vector<16x16xf32>
      %212 = arith.select %209, %210, %211 : vector<16x16xi1>, vector<16x16xf32>
      %c0_96 = arith.constant 0 : index
      %c0_97 = arith.constant 0 : index
      %213 = vector.load %arg18[%c0_96, %c0_97] : memref<16x16xf32, #tpu.memory_space<vmem>>, vector<16x16xf32>
      tpu.vector_store %arg18[%c0_96, %c0_97], %212 {strides = array<i32>} : memref<16x16xf32, #tpu.memory_space<vmem>>, vector<16x16xf32>,
    } else {
    }
    %c0 = arith.constant 0 : index
    %c0_1 = arith.constant 0 : index
    %c0_2 = arith.constant 0 : index
    %3 = vector.load %arg17[%c0, %c0_1, %c0_2] : memref<2x16x32xf32, #tpu.memory_space<vmem>>, vector<2x16x32xf32>
    %4 = vector.shape_cast %3 : vector<2x16x32xf32> to vector<32x32xf32>
    %c0_3 = arith.constant 0 : index
    %c0_4 = arith.constant 0 : index
    %c0_5 = arith.constant 0 : index
    %5 = vector.load %arg3[%c0_3, %c0_4, %c0_5] : memref<1x1x32xf32, #tpu.memory_space<vmem>>, vector<1x1x32xf32>
    %6 = vector.shape_cast %5 : vector<1x1x32xf32> to vector<1x32xf32>
    %c0_6 = arith.constant 0 : index
    %c0_7 = arith.constant 0 : index
    %c0_8 = arith.constant 0 : index
    %7 = vector.load %arg4[%c0_6, %c0_7, %c0_8] : memref<1x1x32xf32, #tpu.memory_space<vmem>>, vector<1x1x32xf32>
    %8 = vector.shape_cast %7 : vector<1x1x32xf32> to vector<1x32xf32>
    %cst = arith.constant dense<0.000000e+00> : vector<32xf32>
    %9 = vector.multi_reduction <add>, %4, %cst [1] : vector<32x32xf32> to vector<32xf32>
    %10 = vector.shape_cast %9 : vector<32xf32> to vector<32x1xf32>
    %cst_9 = arith.constant 3.200000e+01 : f32
    %11 = vector.broadcast %cst_9 : f32 to vector<32x1xf32>
    %12 = arith.divf %10, %11 : vector<32x1xf32>
    %13 = vector.broadcast %12 : vector<32x1xf32> to vector<32x32xf32>
    %14 = arith.subf %4, %13 : vector<32x32xf32>
    %15 = arith.mulf %14, %14 : vector<32x32xf32>
    %cst_10 = arith.constant dense<0.000000e+00> : vector<32xf32>
    %16 = vector.multi_reduction <add>, %15, %cst_10 [1] : vector<32x32xf32> to vector<32xf32>
    %17 = vector.shape_cast %16 : vector<32xf32> to vector<32x1xf32>
    %cst_11 = arith.constant 3.200000e+01 : f32
    %18 = vector.broadcast %cst_11 : f32 to vector<32x1xf32>
    %19 = arith.divf %17, %18 : vector<32x1xf32>
    %cst_12 = arith.constant 9.99999974E-6 : f32
    %20 = vector.broadcast %cst_12 : f32 to vector<32x1xf32>
    %21 = arith.addf %19, %20 : vector<32x1xf32>
    %22 = math.rsqrt %21 : vector<32x1xf32>
    %23 = vector.broadcast %22 : vector<32x1xf32> to vector<32x32xf32>
    %24 = arith.mulf %14, %23 : vector<32x32xf32>
    %25 = vector.broadcast %6 : vector<1x32xf32> to vector<32x32xf32>
    %26 = arith.mulf %24, %25 : vector<32x32xf32>
    %27 = vector.broadcast %8 : vector<1x32xf32> to vector<32x32xf32>
    %28 = arith.addf %26, %27 : vector<32x32xf32>
    %29 = arith.truncf %28 : vector<32x32xf32> to vector<32x32xbf16>
    %c0_13 = arith.constant 0 : index
    %c0_14 = arith.constant 0 : index
    %c0_15 = arith.constant 0 : index
    %30 = vector.load %arg5[%c0_13, %c0_14, %c0_15] : memref<1x32x96xbf16, #tpu.memory_space<vmem>>, vector<1x32x96xbf16>
    %31 = vector.shape_cast %30 : vector<1x32x96xbf16> to vector<32x96xbf16>
    %cst_16 = arith.constant dense<0.000000e+00> : vector<32x96xf32>
    %32 = tpu.matmul %29, %31, %cst_16 {dimension_numbers = #tpu.dot_dimension_numbers<[1], [0], [0], [1], [0, 0, 1, 1], [], []>} : vector<32x32xbf16>, vector<32x96xbf16>, vector<32x96xf32> -> vector<32x96xf32>
    %c0_17 = arith.constant 0 : index
    %c0_18 = arith.constant 0 : index
    %c0_19 = arith.constant 0 : index
    %33 = vector.load %arg6[%c0_17, %c0_18, %c0_19] : memref<1x1x96xf32, #tpu.memory_space<vmem>>, vector<1x1x96xf32>
    %34 = vector.shape_cast %33 : vector<1x1x96xf32> to vector<1x96xf32>
    %35 = vector.broadcast %34 : vector<1x96xf32> to vector<32x96xf32>
    %36 = arith.addf %32, %35 : vector<32x96xf32>
    %37 = arith.truncf %36 : vector<32x96xf32> to vector<32x96xbf16>
    %38 = vector.shape_cast %37 : vector<32x96xbf16> to vector<2x16x96xbf16>
    %39 = vector.extract_strided_slice %38 {offsets = [0, 0, 0], sizes = [2, 16, 32], strides = [1, 1, 1]} : vector<2x16x96xbf16> to vector<2x16x32xbf16>
    %40 = vector.extract_strided_slice %38 {offsets = [0, 0, 32], sizes = [2, 16, 32], strides = [1, 1, 1]} : vector<2x16x96xbf16> to vector<2x16x32xbf16>
    %41 = vector.extract_strided_slice %38 {offsets = [0, 0, 64], sizes = [2, 16, 32], strides = [1, 1, 1]} : vector<2x16x96xbf16> to vector<2x16x32xbf16>
    %c0_20 = arith.constant 0 : index
    %c0_21 = arith.constant 0 : index
    %42 = vector.load %arg18[%c0_20, %c0_21] : memref<16x16xf32, #tpu.memory_space<vmem>>, vector<16x16xf32>
    %43 = vector.shape_cast %42 : vector<16x16xf32> to vector<1x16x16xf32>
    %44 = vector.extract_strided_slice %39 {offsets = [0, 0, 0], sizes = [2, 16, 8], strides = [1, 1, 1]} : vector<2x16x32xbf16> to vector<2x16x8xbf16>
    %45 = vector.extract_strided_slice %40 {offsets = [0, 0, 0], sizes = [2, 16, 8], strides = [1, 1, 1]} : vector<2x16x32xbf16> to vector<2x16x8xbf16>
    %46 = vector.extract_strided_slice %41 {offsets = [0, 0, 0], sizes = [2, 16, 8], strides = [1, 1, 1]} : vector<2x16x32xbf16> to vector<2x16x8xbf16>
    "tpu.trace_start"() <{level = 10 : i32, message = "btd,bsd->bts"}> : () -> ()
    %cst_22 = arith.constant dense<0.000000e+00> : vector<2x16x16xf32>
    %47 = tpu.matmul %44, %45, %cst_22 {dimension_numbers = #tpu.dot_dimension_numbers<[2], [2], [1], [1], [0, 0, 0, 1, 1, 1], [0], [0]>} : vector<2x16x8xbf16>, vector<2x16x8xbf16>, vector<2x16x16xf32> -> vector<2x16x16xf32>
    "tpu.trace_stop"() : () -> ()
    %cst_23 = arith.constant 0.353553385 : f32
    %48 = vector.broadcast %cst_23 : f32 to vector<2x16x16xf32>
    %49 = arith.mulf %47, %48 : vector<2x16x16xf32>
    %50 = vector.broadcast %43 : vector<1x16x16xf32> to vector<2x16x16xf32>
    %51 = arith.addf %49, %50 : vector<2x16x16xf32>
    %cst_24 = arith.constant dense<0xFF800000> : vector<2x16xf32>
    %52 = vector.multi_reduction <maximumf>, %51, %cst_24 [2] : vector<2x16x16xf32> to vector<2x16xf32>
    %53 = vector.shape_cast %52 : vector<2x16xf32> to vector<2x16x1xf32>
    %54 = vector.broadcast %53 : vector<2x16x1xf32> to vector<2x16x16xf32>
    %55 = arith.subf %51, %54 : vector<2x16x16xf32>
    %56 = math.exp %55 : vector<2x16x16xf32>
    %cst_25 = arith.constant dense<0.000000e+00> : vector<2x16xf32>
    %57 = vector.multi_reduction <add>, %56, %cst_25 [2] : vector<2x16x16xf32> to vector<2x16xf32>
    %58 = vector.shape_cast %57 : vector<2x16xf32> to vector<2x16x1xf32>
    %59 = tpu.reciprocal %58 {approx = true} : vector<2x16x1xf32> -> vector<2x16x1xf32>
    %60 = vector.broadcast %59 : vector<2x16x1xf32> to vector<2x16x16xf32>
    %61 = arith.mulf %56, %60 : vector<2x16x16xf32>
    %62 = arith.truncf %61 : vector<2x16x16xf32> to vector<2x16x16xbf16>
    "tpu.trace_start"() <{level = 10 : i32, message = "bts,bsd->btd"}> : () -> ()
    %cst_26 = arith.constant dense<0.000000e+00> : vector<2x16x8xf32>
    %63 = tpu.matmul %62, %46, %cst_26 {dimension_numbers = #tpu.dot_dimension_numbers<[2], [1], [1], [2], [0, 0, 0, 1, 1, 2], [0], [0]>} : vector<2x16x16xbf16>, vector<2x16x8xbf16>, vector<2x16x8xf32> -> vector<2x16x8xf32>
    "tpu.trace_stop"() : () -> ()
    %64 = vector.shape_cast %63 : vector<2x16x8xf32> to vector<32x8xf32>
    %65 = arith.truncf %64 : vector<32x8xf32> to vector<32x8xbf16>
    %c0_27 = arith.constant 0 : index
    %c0_28 = arith.constant 0 : index
    %66 = vector.load %arg19[%c0_27, %c0_28] : memref<32x32xbf16, #tpu.memory_space<vmem>>, vector<32x8xbf16>
    tpu.vector_store %arg19[%c0_27, %c0_28], %65 {strides = array<i32>} : memref<32x32xbf16, #tpu.memory_space<vmem>>, vector<32x8xbf16>,
    %67 = vector.extract_strided_slice %39 {offsets = [0, 0, 8], sizes = [2, 16, 8], strides = [1, 1, 1]} : vector<2x16x32xbf16> to vector<2x16x8xbf16>
    %68 = vector.extract_strided_slice %40 {offsets = [0, 0, 8], sizes = [2, 16, 8], strides = [1, 1, 1]} : vector<2x16x32xbf16> to vector<2x16x8xbf16>
    %69 = vector.extract_strided_slice %41 {offsets = [0, 0, 8], sizes = [2, 16, 8], strides = [1, 1, 1]} : vector<2x16x32xbf16> to vector<2x16x8xbf16>
    "tpu.trace_start"() <{level = 10 : i32, message = "btd,bsd->bts"}> : () -> ()
    %cst_29 = arith.constant dense<0.000000e+00> : vector<2x16x16xf32>
    %70 = tpu.matmul %67, %68, %cst_29 {dimension_numbers = #tpu.dot_dimension_numbers<[2], [2], [1], [1], [0, 0, 0, 1, 1, 1], [0], [0]>} : vector<2x16x8xbf16>, vector<2x16x8xbf16>, vector<2x16x16xf32> -> vector<2x16x16xf32>
    "tpu.trace_stop"() : () -> ()
    %cst_30 = arith.constant 0.353553385 : f32
    %71 = vector.broadcast %cst_30 : f32 to vector<2x16x16xf32>
    %72 = arith.mulf %70, %71 : vector<2x16x16xf32>
    %73 = vector.broadcast %43 : vector<1x16x16xf32> to vector<2x16x16xf32>
    %74 = arith.addf %72, %73 : vector<2x16x16xf32>
    %cst_31 = arith.constant dense<0xFF800000> : vector<2x16xf32>
    %75 = vector.multi_reduction <maximumf>, %74, %cst_31 [2] : vector<2x16x16xf32> to vector<2x16xf32>
    %76 = vector.shape_cast %75 : vector<2x16xf32> to vector<2x16x1xf32>
    %77 = vector.broadcast %76 : vector<2x16x1xf32> to vector<2x16x16xf32>
    %78 = arith.subf %74, %77 : vector<2x16x16xf32>
    %79 = math.exp %78 : vector<2x16x16xf32>
    %cst_32 = arith.constant dense<0.000000e+00> : vector<2x16xf32>
    %80 = vector.multi_reduction <add>, %79, %cst_32 [2] : vector<2x16x16xf32> to vector<2x16xf32>
    %81 = vector.shape_cast %80 : vector<2x16xf32> to vector<2x16x1xf32>
    %82 = tpu.reciprocal %81 {approx = true} : vector<2x16x1xf32> -> vector<2x16x1xf32>
    %83 = vector.broadcast %82 : vector<2x16x1xf32> to vector<2x16x16xf32>
    %84 = arith.mulf %79, %83 : vector<2x16x16xf32>
    %85 = arith.truncf %84 : vector<2x16x16xf32> to vector<2x16x16xbf16>
    "tpu.trace_start"() <{level = 10 : i32, message = "bts,bsd->btd"}> : () -> ()
    %cst_33 = arith.constant dense<0.000000e+00> : vector<2x16x8xf32>
    %86 = tpu.matmul %85, %69, %cst_33 {dimension_numbers = #tpu.dot_dimension_numbers<[2], [1], [1], [2], [0, 0, 0, 1, 1, 2], [0], [0]>} : vector<2x16x16xbf16>, vector<2x16x8xbf16>, vector<2x16x8xf32> -> vector<2x16x8xf32>
    "tpu.trace_stop"() : () -> ()
    %87 = vector.shape_cast %86 : vector<2x16x8xf32> to vector<32x8xf32>
    %88 = arith.truncf %87 : vector<32x8xf32> to vector<32x8xbf16>
    %c0_34 = arith.constant 0 : index
    %c8 = arith.constant 8 : index
    %89 = vector.load %arg19[%c0_34, %c8] : memref<32x32xbf16, #tpu.memory_space<vmem>>, vector<32x8xbf16>
    tpu.vector_store %arg19[%c0_34, %c8], %88 {strides = array<i32>} : memref<32x32xbf16, #tpu.memory_space<vmem>>, vector<32x8xbf16>,
    %90 = vector.extract_strided_slice %39 {offsets = [0, 0, 16], sizes = [2, 16, 8], strides = [1, 1, 1]} : vector<2x16x32xbf16> to vector<2x16x8xbf16>
    %91 = vector.extract_strided_slice %40 {offsets = [0, 0, 16], sizes = [2, 16, 8], strides = [1, 1, 1]} : vector<2x16x32xbf16> to vector<2x16x8xbf16>
    %92 = vector.extract_strided_slice %41 {offsets = [0, 0, 16], sizes = [2, 16, 8], strides = [1, 1, 1]} : vector<2x16x32xbf16> to vector<2x16x8xbf16>
    "tpu.trace_start"() <{level = 10 : i32, message = "btd,bsd->bts"}> : () -> ()
    %cst_35 = arith.constant dense<0.000000e+00> : vector<2x16x16xf32>
    %93 = tpu.matmul %90, %91, %cst_35 {dimension_numbers = #tpu.dot_dimension_numbers<[2], [2], [1], [1], [0, 0, 0, 1, 1, 1], [0], [0]>} : vector<2x16x8xbf16>, vector<2x16x8xbf16>, vector<2x16x16xf32> -> vector<2x16x16xf32>
    "tpu.trace_stop"() : () -> ()
    %cst_36 = arith.constant 0.353553385 : f32
    %94 = vector.broadcast %cst_36 : f32 to vector<2x16x16xf32>
    %95 = arith.mulf %93, %94 : vector<2x16x16xf32>
    %96 = vector.broadcast %43 : vector<1x16x16xf32> to vector<2x16x16xf32>
    %97 = arith.addf %95, %96 : vector<2x16x16xf32>
    %cst_37 = arith.constant dense<0xFF800000> : vector<2x16xf32>
    %98 = vector.multi_reduction <maximumf>, %97, %cst_37 [2] : vector<2x16x16xf32> to vector<2x16xf32>
    %99 = vector.shape_cast %98 : vector<2x16xf32> to vector<2x16x1xf32>
    %100 = vector.broadcast %99 : vector<2x16x1xf32> to vector<2x16x16xf32>
    %101 = arith.subf %97, %100 : vector<2x16x16xf32>
    %102 = math.exp %101 : vector<2x16x16xf32>
    %cst_38 = arith.constant dense<0.000000e+00> : vector<2x16xf32>
    %103 = vector.multi_reduction <add>, %102, %cst_38 [2] : vector<2x16x16xf32> to vector<2x16xf32>
    %104 = vector.shape_cast %103 : vector<2x16xf32> to vector<2x16x1xf32>
    %105 = tpu.reciprocal %104 {approx = true} : vector<2x16x1xf32> -> vector<2x16x1xf32>
    %106 = vector.broadcast %105 : vector<2x16x1xf32> to vector<2x16x16xf32>
    %107 = arith.mulf %102, %106 : vector<2x16x16xf32>
    %108 = arith.truncf %107 : vector<2x16x16xf32> to vector<2x16x16xbf16>
    "tpu.trace_start"() <{level = 10 : i32, message = "bts,bsd->btd"}> : () -> ()
    %cst_39 = arith.constant dense<0.000000e+00> : vector<2x16x8xf32>
    %109 = tpu.matmul %108, %92, %cst_39 {dimension_numbers = #tpu.dot_dimension_numbers<[2], [1], [1], [2], [0, 0, 0, 1, 1, 2], [0], [0]>} : vector<2x16x16xbf16>, vector<2x16x8xbf16>, vector<2x16x8xf32> -> vector<2x16x8xf32>
    "tpu.trace_stop"() : () -> ()
    %110 = vector.shape_cast %109 : vector<2x16x8xf32> to vector<32x8xf32>
    %111 = arith.truncf %110 : vector<32x8xf32> to vector<32x8xbf16>
    %c0_40 = arith.constant 0 : index
    %c16 = arith.constant 16 : index
    %112 = vector.load %arg19[%c0_40, %c16] : memref<32x32xbf16, #tpu.memory_space<vmem>>, vector<32x8xbf16>
    tpu.vector_store %arg19[%c0_40, %c16], %111 {strides = array<i32>} : memref<32x32xbf16, #tpu.memory_space<vmem>>, vector<32x8xbf16>,
    %113 = vector.extract_strided_slice %39 {offsets = [0, 0, 24], sizes = [2, 16, 8], strides = [1, 1, 1]} : vector<2x16x32xbf16> to vector<2x16x8xbf16>
    %114 = vector.extract_strided_slice %40 {offsets = [0, 0, 24], sizes = [2, 16, 8], strides = [1, 1, 1]} : vector<2x16x32xbf16> to vector<2x16x8xbf16>
    %115 = vector.extract_strided_slice %41 {offsets = [0, 0, 24], sizes = [2, 16, 8], strides = [1, 1, 1]} : vector<2x16x32xbf16> to vector<2x16x8xbf16>
    "tpu.trace_start"() <{level = 10 : i32, message = "btd,bsd->bts"}> : () -> ()
    %cst_41 = arith.constant dense<0.000000e+00> : vector<2x16x16xf32>
    %116 = tpu.matmul %113, %114, %cst_41 {dimension_numbers = #tpu.dot_dimension_numbers<[2], [2], [1], [1], [0, 0, 0, 1, 1, 1], [0], [0]>} : vector<2x16x8xbf16>, vector<2x16x8xbf16>, vector<2x16x16xf32> -> vector<2x16x16xf32>
    "tpu.trace_stop"() : () -> ()
    %cst_42 = arith.constant 0.353553385 : f32
    %117 = vector.broadcast %cst_42 : f32 to vector<2x16x16xf32>
    %118 = arith.mulf %116, %117 : vector<2x16x16xf32>
    %119 = vector.broadcast %43 : vector<1x16x16xf32> to vector<2x16x16xf32>
    %120 = arith.addf %118, %119 : vector<2x16x16xf32>
    %cst_43 = arith.constant dense<0xFF800000> : vector<2x16xf32>
    %121 = vector.multi_reduction <maximumf>, %120, %cst_43 [2] : vector<2x16x16xf32> to vector<2x16xf32>
    %122 = vector.shape_cast %121 : vector<2x16xf32> to vector<2x16x1xf32>
    %123 = vector.broadcast %122 : vector<2x16x1xf32> to vector<2x16x16xf32>
    %124 = arith.subf %120, %123 : vector<2x16x16xf32>
    %125 = math.exp %124 : vector<2x16x16xf32>
    %cst_44 = arith.constant dense<0.000000e+00> : vector<2x16xf32>
    %126 = vector.multi_reduction <add>, %125, %cst_44 [2] : vector<2x16x16xf32> to vector<2x16xf32>
    %127 = vector.shape_cast %126 : vector<2x16xf32> to vector<2x16x1xf32>
    %128 = tpu.reciprocal %127 {approx = true} : vector<2x16x1xf32> -> vector<2x16x1xf32>
    %129 = vector.broadcast %128 : vector<2x16x1xf32> to vector<2x16x16xf32>
    %130 = arith.mulf %125, %129 : vector<2x16x16xf32>
    %131 = arith.truncf %130 : vector<2x16x16xf32> to vector<2x16x16xbf16>
    "tpu.trace_start"() <{level = 10 : i32, message = "bts,bsd->btd"}> : () -> ()
    %cst_45 = arith.constant dense<0.000000e+00> : vector<2x16x8xf32>
    %132 = tpu.matmul %131, %115, %cst_45 {dimension_numbers = #tpu.dot_dimension_numbers<[2], [1], [1], [2], [0, 0, 0, 1, 1, 2], [0], [0]>} : vector<2x16x16xbf16>, vector<2x16x8xbf16>, vector<2x16x8xf32> -> vector<2x16x8xf32>
    "tpu.trace_stop"() : () -> ()
    %133 = vector.shape_cast %132 : vector<2x16x8xf32> to vector<32x8xf32>
    %134 = arith.truncf %133 : vector<32x8xf32> to vector<32x8xbf16>
    %c0_46 = arith.constant 0 : index
    %c24 = arith.constant 24 : index
    %135 = vector.load %arg19[%c0_46, %c24] : memref<32x32xbf16, #tpu.memory_space<vmem>>, vector<32x8xbf16>
    tpu.vector_store %arg19[%c0_46, %c24], %134 {strides = array<i32>} : memref<32x32xbf16, #tpu.memory_space<vmem>>, vector<32x8xbf16>,
    %c0_47 = arith.constant 0 : index
    %c0_48 = arith.constant 0 : index
    %136 = vector.load %arg19[%c0_47, %c0_48] : memref<32x32xbf16, #tpu.memory_space<vmem>>, vector<32x32xbf16>
    %c0_49 = arith.constant 0 : index
    %c0_50 = arith.constant 0 : index
    %c0_51 = arith.constant 0 : index
    %137 = vector.load %arg7[%c0_49, %c0_50, %c0_51] : memref<1x32x32xbf16, #tpu.memory_space<vmem>>, vector<1x32x32xbf16>
    %138 = vector.shape_cast %137 : vector<1x32x32xbf16> to vector<32x32xbf16>
    %cst_52 = arith.constant dense<0.000000e+00> : vector<32x32xf32>
    %139 = tpu.matmul %136, %138, %cst_52 {dimension_numbers = #tpu.dot_dimension_numbers<[1], [0], [0], [1], [0, 0, 1, 1], [], []>} : vector<32x32xbf16>, vector<32x32xbf16>, vector<32x32xf32> -> vector<32x32xf32>
    %140 = arith.addf %4, %139 : vector<32x32xf32>
    %c0_53 = arith.constant 0 : index
    %c0_54 = arith.constant 0 : index
    %c0_55 = arith.constant 0 : index
    %141 = vector.load %arg8[%c0_53, %c0_54, %c0_55] : memref<1x1x32xf32, #tpu.memory_space<vmem>>, vector<1x1x32xf32>
    %142 = vector.shape_cast %141 : vector<1x1x32xf32> to vector<1x32xf32>
    %143 = vector.broadcast %142 : vector<1x32xf32> to vector<32x32xf32>
    %144 = arith.addf %140, %143 : vector<32x32xf32>
    %c0_56 = arith.constant 0 : index
    %c0_57 = arith.constant 0 : index
    %c0_58 = arith.constant 0 : index
    %145 = vector.load %arg9[%c0_56, %c0_57, %c0_58] : memref<1x1x32xf32, #tpu.memory_space<vmem>>, vector<1x1x32xf32>
    %146 = vector.shape_cast %145 : vector<1x1x32xf32> to vector<1x32xf32>
    %c0_59 = arith.constant 0 : index
    %c0_60 = arith.constant 0 : index
    %c0_61 = arith.constant 0 : index
    %147 = vector.load %arg10[%c0_59, %c0_60, %c0_61] : memref<1x1x32xf32, #tpu.memory_space<vmem>>, vector<1x1x32xf32>
    %148 = vector.shape_cast %147 : vector<1x1x32xf32> to vector<1x32xf32>
    %cst_62 = arith.constant dense<0.000000e+00> : vector<32xf32>
    %149 = vector.multi_reduction <add>, %144, %cst_62 [1] : vector<32x32xf32> to vector<32xf32>
    %150 = vector.shape_cast %149 : vector<32xf32> to vector<32x1xf32>
    %cst_63 = arith.constant 3.200000e+01 : f32
    %151 = vector.broadcast %cst_63 : f32 to vector<32x1xf32>
    %152 = arith.divf %150, %151 : vector<32x1xf32>
    %153 = vector.broadcast %152 : vector<32x1xf32> to vector<32x32xf32>
    %154 = arith.subf %144, %153 : vector<32x32xf32>
    %155 = arith.mulf %154, %154 : vector<32x32xf32>
    %cst_64 = arith.constant dense<0.000000e+00> : vector<32xf32>
    %156 = vector.multi_reduction <add>, %155, %cst_64 [1] : vector<32x32xf32> to vector<32xf32>
    %157 = vector.shape_cast %156 : vector<32xf32> to vector<32x1xf32>
    %cst_65 = arith.constant 3.200000e+01 : f32
    %158 = vector.broadcast %cst_65 : f32 to vector<32x1xf32>
    %159 = arith.divf %157, %158 : vector<32x1xf32>
    %cst_66 = arith.constant 9.99999974E-6 : f32
    %160 = vector.broadcast %cst_66 : f32 to vector<32x1xf32>
    %161 = arith.addf %159, %160 : vector<32x1xf32>
    %162 = math.rsqrt %161 : vector<32x1xf32>
    %163 = vector.broadcast %162 : vector<32x1xf32> to vector<32x32xf32>
    %164 = arith.mulf %154, %163 : vector<32x32xf32>
    %165 = vector.broadcast %146 : vector<1x32xf32> to vector<32x32xf32>
    %166 = arith.mulf %164, %165 : vector<32x32xf32>
    %167 = vector.broadcast %148 : vector<1x32xf32> to vector<32x32xf32>
    %168 = arith.addf %166, %167 : vector<32x32xf32>
    %169 = arith.truncf %168 : vector<32x32xf32> to vector<32x32xbf16>
    %c0_67 = arith.constant 0 : index
    %c0_68 = arith.constant 0 : index
    %c0_69 = arith.constant 0 : index
    %170 = vector.load %arg11[%c0_67, %c0_68, %c0_69] : memref<1x32x128xbf16, #tpu.memory_space<vmem>>, vector<1x32x128xbf16>
    %171 = vector.shape_cast %170 : vector<1x32x128xbf16> to vector<32x128xbf16>
    %cst_70 = arith.constant dense<0.000000e+00> : vector<32x128xf32>
    %172 = tpu.matmul %169, %171, %cst_70 {dimension_numbers = #tpu.dot_dimension_numbers<[1], [0], [0], [1], [0, 0, 1, 1], [], []>} : vector<32x32xbf16>, vector<32x128xbf16>, vector<32x128xf32> -> vector<32x128xf32>
    %c0_71 = arith.constant 0 : index
    %c0_72 = arith.constant 0 : index
    %c0_73 = arith.constant 0 : index
    %173 = vector.load %arg12[%c0_71, %c0_72, %c0_73] : memref<1x1x128xf32, #tpu.memory_space<vmem>>, vector<1x1x128xf32>
    %174 = vector.shape_cast %173 : vector<1x1x128xf32> to vector<1x128xf32>
    %175 = vector.broadcast %174 : vector<1x128xf32> to vector<32x128xf32>
    %176 = arith.addf %172, %175 : vector<32x128xf32>
    %177 = arith.mulf %176, %176 : vector<32x128xf32>
    %178 = arith.mulf %176, %177 : vector<32x128xf32>
    %cst_74 = arith.constant 4.471500e-02 : f32
    %179 = vector.broadcast %cst_74 : f32 to vector<32x128xf32>
    %180 = arith.mulf %179, %178 : vector<32x128xf32>
    %181 = arith.addf %176, %180 : vector<32x128xf32>
    %cst_75 = arith.constant 0.797884583 : f32
    %182 = vector.broadcast %cst_75 : f32 to vector<32x128xf32>
    %183 = arith.mulf %182, %181 : vector<32x128xf32>
    %184 = math.tanh %183 : vector<32x128xf32>
    %cst_76 = arith.constant 1.000000e+00 : f32
    %185 = vector.broadcast %cst_76 : f32 to vector<32x128xf32>
    %186 = arith.addf %185, %184 : vector<32x128xf32>
    %cst_77 = arith.constant 5.000000e-01 : f32
    %187 = vector.broadcast %cst_77 : f32 to vector<32x128xf32>
    %188 = arith.mulf %187, %186 : vector<32x128xf32>
    %189 = arith.mulf %176, %188 : vector<32x128xf32>
    %190 = arith.truncf %189 : vector<32x128xf32> to vector<32x128xbf16>
    %c0_78 = arith.constant 0 : index
    %c0_79 = arith.constant 0 : index
    %c0_80 = arith.constant 0 : index
    %191 = vector.load %arg13[%c0_78, %c0_79, %c0_80] : memref<1x128x32xbf16, #tpu.memory_space<vmem>>, vector<1x128x32xbf16>
    %192 = vector.shape_cast %191 : vector<1x128x32xbf16> to vector<128x32xbf16>
    %cst_81 = arith.constant dense<0.000000e+00> : vector<32x32xf32>
    %193 = tpu.matmul %190, %192, %cst_81 {dimension_numbers = #tpu.dot_dimension_numbers<[1], [0], [0], [1], [0, 0, 1, 1], [], []>} : vector<32x128xbf16>, vector<128x32xbf16>, vector<32x32xf32> -> vector<32x32xf32>
    %c0_82 = arith.constant 0 : index
    %c0_83 = arith.constant 0 : index
    %c0_84 = arith.constant 0 : index
    %194 = vector.load %arg14[%c0_82, %c0_83, %c0_84] : memref<1x1x32xf32, #tpu.memory_space<vmem>>, vector<1x1x32xf32>
    %195 = vector.shape_cast %194 : vector<1x1x32xf32> to vector<1x32xf32>
    %196 = vector.broadcast %195 : vector<1x32xf32> to vector<32x32xf32>
    %197 = arith.addf %193, %196 : vector<32x32xf32>
    %198 = arith.addf %144, %197 : vector<32x32xf32>
    %c1_i32 = arith.constant 1 : i32
    %199 = arith.cmpi slt, %arg1, %c1_i32 : i32
    %200 = arith.extui %199 : i1 to i32
    %c0_i32_85 = arith.constant 0 : i32
    %201 = arith.cmpi ne, %200, %c0_i32_85 : i32
    scf.if %201 {
      %205 = vector.shape_cast %198 : vector<32x32xf32> to vector<2x16x32xf32>
      %c0_88 = arith.constant 0 : index
      %c0_89 = arith.constant 0 : index
      %c0_90 = arith.constant 0 : index
      %206 = vector.load %arg17[%c0_88, %c0_89, %c0_90] : memref<2x16x32xf32, #tpu.memory_space<vmem>>, vector<2x16x32xf32>
      tpu.vector_store %arg17[%c0_88, %c0_89, %c0_90], %205 {strides = array<i32>} : memref<2x16x32xf32, #tpu.memory_space<vmem>>, vector<2x16x32xf32>,
    } else {
    }
    %c1_i32_86 = arith.constant 1 : i32
    %202 = arith.cmpi eq, %arg1, %c1_i32_86 : i32
    %203 = arith.extui %202 : i1 to i32
    %c0_i32_87 = arith.constant 0 : i32
    %204 = arith.cmpi ne, %203, %c0_i32_87 : i32
    scf.if %204 {
      %c0_88 = arith.constant 0 : index
      %c0_89 = arith.constant 0 : index
      %205 = vector.load %arg15[%c0_88, %c0_89] : memref<1x32xf32, #tpu.memory_space<vmem>>, vector<1x32xf32>
      %c0_90 = arith.constant 0 : index
      %c0_91 = arith.constant 0 : index
      %206 = vector.load %arg16[%c0_90, %c0_91] : memref<1x32xf32, #tpu.memory_space<vmem>>, vector<1x32xf32>
      %cst_92 = arith.constant dense<0.000000e+00> : vector<32xf32>
      %207 = vector.multi_reduction <add>, %198, %cst_92 [1] : vector<32x32xf32> to vector<32xf32>
      %208 = vector.shape_cast %207 : vector<32xf32> to vector<32x1xf32>
      %cst_93 = arith.constant 3.200000e+01 : f32
      %209 = vector.broadcast %cst_93 : f32 to vector<32x1xf32>
      %210 = arith.divf %208, %209 : vector<32x1xf32>
      %211 = vector.broadcast %210 : vector<32x1xf32> to vector<32x32xf32>
      %212 = arith.subf %198, %211 : vector<32x32xf32>
      %213 = arith.mulf %212, %212 : vector<32x32xf32>
      %cst_94 = arith.constant dense<0.000000e+00> : vector<32xf32>
      %214 = vector.multi_reduction <add>, %213, %cst_94 [1] : vector<32x32xf32> to vector<32xf32>
      %215 = vector.shape_cast %214 : vector<32xf32> to vector<32x1xf32>
      %cst_95 = arith.constant 3.200000e+01 : f32
      %216 = vector.broadcast %cst_95 : f32 to vector<32x1xf32>
      %217 = arith.divf %215, %216 : vector<32x1xf32>
      %cst_96 = arith.constant 9.99999974E-6 : f32
      %218 = vector.broadcast %cst_96 : f32 to vector<32x1xf32>
      %219 = arith.addf %217, %218 : vector<32x1xf32>
      %220 = math.rsqrt %219 : vector<32x1xf32>
      %221 = vector.broadcast %220 : vector<32x1xf32> to vector<32x32xf32>
      %222 = arith.mulf %212, %221 : vector<32x32xf32>
      %223 = vector.broadcast %205 : vector<1x32xf32> to vector<32x32xf32>
      %224 = arith.mulf %222, %223 : vector<32x32xf32>
      %225 = vector.broadcast %206 : vector<1x32xf32> to vector<32x32xf32>
      %226 = arith.addf %224, %225 : vector<32x32xf32>
      %227 = vector.shape_cast %226 : vector<32x32xf32> to vector<2x16x32xf32>
      %c0_97 = arith.constant 0 : index
      %c0_98 = arith.constant 0 : index
      %c0_99 = arith.constant 0 : index
      %228 = vector.load %arg17[%c0_97, %c0_98, %c0_99] : memref<2x16x32xf32, #tpu.memory_space<vmem>>, vector<2x16x32xf32>
      tpu.vector_store %arg17[%c0_97, %c0_98, %c0_99], %227 {strides = array<i32>} : memref<2x16x32xf32, #tpu.memory_space<vmem>>, vector<2x16x32xf32>,
    } else {
    }
    return
  }
  func.func @transform_0(%arg0: i32, %arg1: i32) -> (i32, i32, i32) {
    %c0_i32 = arith.constant 0 : i32
    %c0_i32_0 = arith.constant 0 : i32
    %c0_i32_1 = arith.constant 0 : i32
    return %arg0, %c0_i32, %c0_i32_0 : i32, i32, i32
  }
  func.func @transform_1(%arg0: i32, %arg1: i32) -> (i32, i32, i32) {
    %c0_i32 = arith.constant 0 : i32
    %c0_i32_0 = arith.constant 0 : i32
    %c0_i32_1 = arith.constant 0 : i32
    return %arg1, %c0_i32, %c0_i32_0 : i32, i32, i32
  }
  func.func @transform_2(%arg0: i32, %arg1: i32) -> (i32, i32, i32) {
    %c0_i32 = arith.constant 0 : i32
    %c0_i32_0 = arith.constant 0 : i32
    %c0_i32_1 = arith.constant 0 : i32
    return %arg1, %c0_i32, %c0_i32_0 : i32, i32, i32
  }
  func.func @transform_3(%arg0: i32, %arg1: i32) -> (i32, i32, i32) {
    %c0_i32 = arith.constant 0 : i32
    %c0_i32_0 = arith.constant 0 : i32
    %c0_i32_1 = arith.constant 0 : i32
    return %arg1, %c0_i32, %c0_i32_0 : i32, i32, i32
  }
  func.func @transform_4(%arg0: i32, %arg1: i32) -> (i32, i32, i32) {
    %c0_i32 = arith.constant 0 : i32
    %c0_i32_0 = arith.constant 0 : i32
    %c0_i32_1 = arith.constant 0 : i32
    return %arg1, %c0_i32, %c0_i32_0 : i32, i32, i32
  }
  func.func @transform_5(%arg0: i32, %arg1: i32) -> (i32, i32, i32) {
    %c0_i32 = arith.constant 0 : i32
    %c0_i32_0 = arith.constant 0 : i32
    %c0_i32_1 = arith.constant 0 : i32
    return %arg1, %c0_i32, %c0_i32_0 : i32, i32, i32
  }
  func.func @transform_6(%arg0: i32, %arg1: i32) -> (i32, i32, i32) {
    %c0_i32 = arith.constant 0 : i32
    %c0_i32_0 = arith.constant 0 : i32
    %c0_i32_1 = arith.constant 0 : i32
    return %arg1, %c0_i32, %c0_i32_0 : i32, i32, i32
  }
  func.func @transform_7(%arg0: i32, %arg1: i32) -> (i32, i32, i32) {
    %c0_i32 = arith.constant 0 : i32
    %c0_i32_0 = arith.constant 0 : i32
    %c0_i32_1 = arith.constant 0 : i32
    return %arg1, %c0_i32, %c0_i32_0 : i32, i32, i32
  }
  func.func @transform_8(%arg0: i32, %arg1: i32) -> (i32, i32, i32) {
    %c0_i32 = arith.constant 0 : i32
    %c0_i32_0 = arith.constant 0 : i32
    %c0_i32_1 = arith.constant 0 : i32
    return %arg1, %c0_i32, %c0_i32_0 : i32, i32, i32
  }
  func.func @transform_9(%arg0: i32, %arg1: i32) -> (i32, i32, i32) {
    %c0_i32 = arith.constant 0 : i32
    %c0_i32_0 = arith.constant 0 : i32
    %c0_i32_1 = arith.constant 0 : i32
    return %arg1, %c0_i32, %c0_i32_0 : i32, i32, i32
  }
  func.func @transform_10(%arg0: i32, %arg1: i32) -> (i32, i32, i32) {
    %c0_i32 = arith.constant 0 : i32
    %c0_i32_0 = arith.constant 0 : i32
    %c0_i32_1 = arith.constant 0 : i32
    return %arg1, %c0_i32, %c0_i32_0 : i32, i32, i32
  }
  func.func @transform_11(%arg0: i32, %arg1: i32) -> (i32, i32, i32) {
    %c0_i32 = arith.constant 0 : i32
    %c0_i32_0 = arith.constant 0 : i32
    %c0_i32_1 = arith.constant 0 : i32
    return %arg1, %c0_i32, %c0_i32_0 : i32, i32, i32
  }
  func.func @transform_12(%arg0: i32, %arg1: i32) -> (i32, i32, i32) {
    %c0_i32 = arith.constant 0 : i32
    %c0_i32_0 = arith.constant 0 : i32
    %c0_i32_1 = arith.constant 0 : i32
    return %arg1, %c0_i32, %c0_i32_0 : i32, i32, i32
  }
  func.func @transform_13(%arg0: i32, %arg1: i32) -> (i32, i32) {
    %c0_i32 = arith.constant 0 : i32
    %c0_i32_0 = arith.constant 0 : i32
    %c0_i32_1 = arith.constant 0 : i32
    return %c0_i32, %c0_i32_0 : i32, i32
  }
  func.func @transform_14(%arg0: i32, %arg1: i32) -> (i32, i32) {
    %c0_i32 = arith.constant 0 : i32
    %c0_i32_0 = arith.constant 0 : i32
    %c0_i32_1 = arith.constant 0 : i32
    return %c0_i32, %c0_i32_0 : i32, i32
  }
  func.func @transform_15(%arg0: i32, %arg1: i32) -> (i32, i32, i32) {
    %c0_i32 = arith.constant 0 : i32
    %c0_i32_0 = arith.constant 0 : i32
    %c0_i32_1 = arith.constant 0 : i32
    return %arg0, %c0_i32, %c0_i32_0 : i32, i32, i32
  }
}

</mosaic_0001>

<bundles_post_ra>
// kernel: gpt_decoder_forward.3
= control target key start
LH: loop header
LB: loop body
LE: loop exit
PB: predicated region body
PF: predicated region fallthrough
CT: control target
= control target key end

     0   :  { %vm34_vm0 = vcmask 261120   ;;  %s161_s1 = inlined_call_operand.vmem [shape: bf16[32,128], index: 1, kind: input, shape index: {}]   ;;  %s162_s0 = inlined_call_operand.vmem [shape: f32[2,16,32], index: 0, kind: input, shape index: {}]   ;;  %s163_s2 = inlined_call_operand.vmem [shape: f32[2,16,128], index: 2, kind: output, shape index: {}]  }
   0x1   :  { %v114_v0 = vld [vmem:[%s161_s1] sm:$0xff]   ;;  %v115_v1 = vld [vmem:[%s161_s1 + $0x8] sm:$0xff]   ;;  %v14_v5 = vld [vmem:[%s162_s0 + $0x10] sm:$0xff] }
   0x2   :  { %106 = vmatprep.subr.bf16.mxu0 %v114_v0  ;;  %v12_v2 = vld [vmem:[%s162_s0] sm:$0xff]  ;;  %v13_v3 = vld [vmem:[%s162_s0 + $0x8] sm:$0xff]  ;;  %v15_v6 = vld [vmem:[%s162_s0 + $0x18] sm:$0xff] }
   0x3   :  { %107 = vmatpush3.bf16.msra.mxu0 %v114_v0  ;;  %v16_v4 = vpack.c.bf16 %v13_v3, %v12_v2  ;;  %v17_v7 = vpack.c.bf16 %v15_v6, %v14_v5 }
   0x4   :  { %108 = vmatprep.subr.bf16.mxu0 %v115_v1 }
   0x5   :  { %110 = vmatprep.mubr.msk.bf16.mxu0 %vm34_vm0, %v16_v4 }
   0x7   :  { %109 = vmatpush3.bf16.msra.mxu0 %v115_v1 }
   0xa   :  { %111 = vmatmul.mubr.msk.bf16.vlgmr.msra.gmra.mrb[0].mxu0 %vm34_vm0, %v17_v7 }
  0xdd   :  { %v112_v8 = vpop.f32.mrb[0].mxu0 }
  0xde   :  { %92 = vst [vmem:[%s163_s2 + $0x10] sm:$0xff] %v112_v8  ;;  %v75_v9 = vpop.f32.mrb[1].mxu0 }
  0xdf   :  { %90 = vst [vmem:[%s163_s2] sm:$0xff] %v75_v9  ;;  %v113_v10 = vpop.f32.mrb[2].mxu0 }
  0xe0   :  { %93 = vst [vmem:[%s163_s2 + $0x18] sm:$0xff] %v113_v10  ;;  %v78_v11 = vpop.f32.mrb[3].mxu0 }
  0xe1   :  { %91 = vst [vmem:[%s163_s2 + $0x8] sm:$0xff] %v78_v11 }

// kernel: gpt_decoder_forward.2
= control target key start
LH: loop header
LB: loop body
LE: loop exit
PB: predicated region body
PF: predicated region fallthrough
CT: control target
= control target key end

     0   :  { %s3161_s18 = smov 0   ;;  %s3163_s19 = smov 0   ;;  %s3622_s0 = inlined_call_operand.vmem [shape: f32[2,16,32], index: 0, kind: input, shape index: {}, may-alias: {0,15}]   ;;  %s3623_s1 = inlined_call_operand.vmem [shape: f32[2,1,32], index: 1, kind: input, shape index: {}]   ;;  %s3624_s2 = inlined_call_operand.vmem [shape: f32[2,1,32], index: 2, kind: input, shape index: {}]   ;;  %s3625_s3 = inlined_call_operand.vmem [shape: bf16[2,32,96], index: 3, kind: input, shape index: {}]   ;;  %s3626_s4 = inlined_call_operand.vmem [shape: f32[2,1,96], index: 4, kind: input, shape index: {}]   ;;  %s3627_s5 = inlined_call_operand.vmem [shape: bf16[2,32,32], index: 5, kind: input, shape index: {}]   ;;  %s3628_s6 = inlined_call_operand.vmem [shape: f32[2,1,32], index: 6, kind: input, shape index: {}]   ;;  %s3629_s7 = inlined_call_operand.vmem [shape: f32[2,1,32], index: 7, kind: input, shape index: {}]   ;;  %s3630_s8 = inlined_call_operand.vmem [shape: f32[2,1,32], index: 8, kind: input, shape index: {}]   ;;  %s3631_s9 = inlined_call_operand.vmem [shape: bf16[2,32,128], index: 9, kind: input, shape index: {}]   ;;  %s3632_s10 = inlined_call_operand.vmem [shape: f32[2,1,128], index: 10, kind: input, shape index: {}]   ;;  %s3633_s11 = inlined_call_operand.vmem [shape: bf16[2,128,32], index: 11, kind: input, shape index: {}]   ;;  %s3634_s12 = inlined_call_operand.vmem [shape: f32[2,1,32], index: 12, kind: input, shape index: {}]   ;;  %s3635_s13 = inlined_call_operand.vmem [shape: f32[1,32], index: 13, kind: input, shape index: {}]   ;;  %s3636_s14 = inlined_call_operand.vmem [shape: f32[1,32], index: 14, kind: input, shape index: {}]   ;;  %s3637_s15 = inlined_call_operand.vmem [shape: f32[2,16,32], index: 15, kind: output, shape index: {}, may-alias: {0,15}]  }
   0x1   :  { %3641 = sst [smem:[#allocation8_spill]] %s3624_s2  ;;  %s3165_s20 = smov 0  }
   0x2   :  { %3642 = sst [smem:[#allocation9_spill]] %s3625_s3 }
   0x3   :  { %3643 = sst [smem:[#allocation10_spill]] %s3627_s5 }
   0x4   :  { %3644 = sst [smem:[#allocation11_spill]] %s3635_s13 }
   0x5   :  { %3645 = sst [smem:[#allocation12_spill]] %s3636_s14 }
   0x6 LB: > { %3646 = sst [smem:[#allocation4_spill]] %s3058_s19  ;;  %s34_s21 = sadd.s32 1, %s3058_s19  ;;  %s3062_s20 = sphi %s3165_s20, %s25_s20   ;;  %s3058_s19 = sphi %s3163_s19, %s3663_s19   ;;  %s3054_s18 = sphi %s3161_s18, %s3662_s18  }
   0x7   : > { %3647 = sst [smem:[#allocation5_spill]] %s3062_s20  ;;  %p2625_p0 = scmp.ge.s32.totalorder %s3062_s20, 1 }
   0x8   : > { %p35_p1 = scmp.ge.s32.totalorder %s34_s21, 2  ;;  %p555_p2 = scmp.lt.s32.totalorder %s3062_s20, 3 }
   0xa   : > { %s3665_s21 = smov (%p35_p1, %s34_s21), 0  ;;  %p556_p3 = pnand %p2625_p0, %p555_p2 }
   0xb   : > { %3648 = sst [smem:[#allocation6_spill]] %s3665_s21 }
   0xc   : > { %559 = sbr.rel (%p556_p3) target bundleno = 4640 (0x1220), region = 80 }
  0x13   : > { %p656_p4 = scmp.lt.s32.totalorder %s3054_s18, 1  ;;  %s3650_s3 = sld [smem:[#allocation9_spill]] }
  0x14   : > { %s3651_s5 = sld [smem:[#allocation10_spill]]  ;;  %p2634_p5 = scmp.ne.s32.totalorder %s3054_s18, 0 }
  0x15   : > { %s3183_s22 = scalar_select %p656_p4, %s3054_s18, 1 }
  0x16   : > { %711 = sbr.rel (%p2634_p5) target bundleno = 33 (0x21), region = 84  ;;  %v712_v0 = vld [vmem:[%s3622_s0] sm:$0xff] (!%p2634_p5)  ;;  %vm716_vm0 = vcmask (!%p2634_p5), 261120   ;;  %v713_v1 = vld [vmem:[%s3622_s0 + $0x8] sm:$0xff] (!%p2634_p5)  ;;  %v714_v2 = vld [vmem:[%s3622_s0 + $0x10] sm:$0xff] (!%p2634_p5)  ;;  %v721_v3 = vlaneseq (!%p2634_p5)  ;;  %vm730_vm1 = vcmask (!%p2634_p5), 130048  }
  0x17   : > { %s2687_s29 = sshll.u32 %s3183_s22, 4  ;;  %s680_s2 = scalar_lea.vmem %s3629_s7, %s3183_s22  ;;  %717 = vst.msk [vmem:[%s3637_s15] sm:$0xff] (!%p2634_p5), %vm716_vm0, %v712_v0  ;;  %718 = vst.msk [vmem:[%s3637_s15 + $0x8] sm:$0xff] (!%p2634_p5), %vm716_vm0, %v713_v1  ;;  %v3064_v8 = vmov (!%p2634_p5), -1e+30  }
  0x18   : > { %s683_s17 = scalar_lea.vmem %s3630_s8, %s3183_s22  ;;  %s699_s30 = scalar_lea.vmem %s3634_s12, %s3183_s22  ;;  %719 = vst.msk [vmem:[%s3637_s15 + $0x10] sm:$0xff] (!%p2634_p5), %vm716_vm0, %v714_v2  ;;  %v722_v5 = vshrl.u32 (!%p2634_p5), %v721_v3, 7  ;;  %v725_v6 = vand.u32 (!%p2634_p5), 127, %v721_v3 }
  0x19   : > { %s3201_s21 = scalar_lea.vmem %s3650_s3, %s2687_s29  ;;  %s3223_s3 = scalar_lea.vmem %s3631_s9, %s2687_s29 }
  0x1a   : > { %s3206_s14 = scalar_lea.vmem %s3651_s5, %s2687_s29  ;;  %s691_s5 = scalar_lea.vmem %s3632_s10, %s3183_s22  ;;  %vm726_vm2 = vcmp.le.s32.totalorder (!%p2634_p5), %v725_v6, %v722_v5  ;;  %v723_v7 = vadd.s32 (!%p2634_p5), 8, %v722_v5 }
  0x1b   : > { %3652 = sst [smem:[#allocation7_spill]] %s3206_s14  ;;  %s2690_s14 = sshll.u32 %s3183_s22, 6  ;;  %v728_v9 = vsel (!%p2634_p5), %vm726_vm2, 0.0, %v3064_v8 }
  0x1c   : > { %s3233_s26 = scalar_lea.vmem %s3633_s11, %s2690_s14  ;;  %731 = vst.msk [vmem:[#allocation2] sm:$0xff] (!%p2634_p5), %vm730_vm1, %v728_v9  ;;  %vm727_vm3 = vcmp.le.s32.totalorder (!%p2634_p5), %v725_v6, %v723_v7 }
  0x1d   : > { %v729_v10 = vsel %vm727_vm3, 0.0, %v3064_v8 }
  0x1e   : > { %732 = vst.msk [vmem:[#allocation2 + $0x8] sm:$0xff] %vm730_vm1, %v729_v10 }
  0x1f   : > { %v715_v4 = vld [vmem:[%s3622_s0 + $0x18] sm:$0xff] }
  0x20   : > { %720 = vst.msk [vmem:[%s3637_s15 + $0x18] sm:$0xff] %vm716_vm0, %v715_v4 }
  0x21 PF: > { %vm739_vm4 = vcmask 261120   ;;  %v2926_v39 = vld [vmem:[%s3201_s21] sm:$0xff]   ;;  %v2927_v40 = vld [vmem:[%s3201_s21 + $0x8] sm:$0xff]   ;;  %s3653_s24 = scalar_lea.vmem %s3623_s1, %s3183_s22  ;;  %s3654_s14 = sld [smem:[#allocation8_spill]]  ;;  %v3065_v9 = vmov 0.0   ;;  %vm3066_vm5 = vmmov 0  }
  0x22   : > { %v733_v11 = vld [vmem:[%s3637_s15] sm:$0xff]  ;;  %v734_v13 = vld [vmem:[%s3637_s15 + $0x8] sm:$0xff]  ;;  %2745 = vmatprep.subr.bf16.mxu0 %v2926_v39  ;;  %2765 = vmatprep.subr.bf16.mxu1 %v3065_v9  ;;  %s3656_s27 = scalar_lea.vmem %s3626_s4, %s3183_s22  ;;  %s3067_s16 = smov 96   ;;  %vm900_vm6 = vcmask 64512   ;;  %vm1006_vm7 = vcmask 130048   ;;  %vm1411_vm8 = vcmask 130112  }
  0x23   : > { %v735_v12 = vld [vmem:[%s3637_s15 + $0x10] sm:$0xff]  ;;  %v740_v14 = vsel %vm739_vm4, %v733_v11, 0.0  ;;  %v743_v17 = vsel %vm739_vm4, %v734_v13, 0.0  ;;  %2746 = vmatpush3.bf16.msra.mxu0 %v2926_v39  ;;  %v2635_v55 = vld [vmem:[%s3653_s24] ss:$0 sm:$0xff]  ;;  %2767 = vmatprep.mubr.msk.bf16.mxu1 %vm3066_vm5, %v3065_v9  ;;  %s3068_s29 = smov 64  }
  0x24   : > { %v746_v15 = vsel %vm739_vm4, %v735_v12, 0.0  ;;  %741 = vadd.xlane.f32.xlu0 %v740_v14  ;;  %2747 = vmatprep.subr.bf16.mxu0 %v2927_v40  ;;  %s3069_s21 = smov 88   ;;  %s3070_s23 = smov 120   ;;  %vm1674_vm9 = vcmask 195712   ;;  %vm1937_vm10 = vcmask 261312  }
  0x25   : > { %747 = vadd.xlane.f32.xlu1 %v746_v15  ;;  %s3071_s24 = smov 56   ;;  %s3072_s19 = smov 80  }
  0x26   : > { %s3073_s20 = smov 112   ;;  %s3076_s25 = smov 104  }
  0x27   : > { %v736_v16 = vld [vmem:[%s3637_s15 + $0x18] sm:$0xff]  ;;  %2748 = vmatpush3.bf16.msra.mxu0 %v2927_v40  ;;  %s3655_s13 = scalar_lea.vmem %s3654_s14, %s3183_s22  ;;  %s3074_s14 = smov 48  }
  0x28   : > { %v749_v18 = vsel %vm739_vm4, %v736_v16, 0.0  ;;  %744 = vadd.xlane.f32.xlu0 %v743_v17  ;;  %v2636_v61 = vld [vmem:[%s3655_s13] ss:$0 sm:$0xff]  ;;  %2753 = vmatprep.subr.bf16.mxu0 %v3065_v9  ;;  %s3075_s13 = smov 72   ;;  %s3077_s28 = smov 40  }
  0x29   : > { %750 = vadd.xlane.f32.xlu1 %v749_v18  ;;  %p2679_p6 = scmp.ge.s32.totalorder %s3054_s18, 1 }
  0xb1   : > { %v742_v19 = vpop.xlane.xlu0 %741 }
  0xb2   : > { %v748_v20 = vpop.xlane.xlu1 %747  ;;  %v753_v21 = vmul.f32 0.03125, %v742_v19 }
  0xb3   : > { %v755_v22 = vmul.f32 0.03125, %v748_v20 }
  0xb4   : > { %v757_v23 = vsub.f32 %v733_v11, %v753_v21  ;;  %v2637_v11 = vld [vmem:[%s3656_s27] ss:$0 sm:$0xff]  ;;  %s3078_s27 = smov 8  }
  0xb5   : > { %v759_v24 = vsub.f32 %v735_v12, %v755_v22  ;;  %v745_v25 = vpop.xlane.xlu0 %744 }
  0xb6   : > { %v751_v26 = vpop.xlane.xlu1 %750  ;;  %v754_v27 = vmul.f32 0.03125, %v745_v25  ;;  %v761_v29 = vmul.f32 %v757_v23, %v757_v23 }
  0xb7   : > { %v756_v28 = vmul.f32 0.03125, %v751_v26  ;;  %v763_v30 = vmul.f32 %v759_v24, %v759_v24  ;;  %v3327_v26 = vld [vmem:[#allocation2] sm:$0xff] }
  0xb8   : > { %v758_v31 = vsub.f32 %v734_v13, %v754_v27  ;;  %v765_v33 = vsel %vm739_vm4, %v761_v29, 0.0 }
  0xb9   : > { %v760_v32 = vsub.f32 %v736_v16, %v756_v28  ;;  %766 = vadd.xlane.f32.xlu0 %v765_v33  ;;  %v771_v34 = vsel %vm739_vm4, %v763_v30, 0.0  ;;  %v3329_v30 = vld [vmem:[#allocation2 + $0x8] sm:$0xff] }
  0xba   : > { %v762_v35 = vmul.f32 %v758_v31, %v758_v31 }
  0xbb   : > { %v764_v36 = vmul.f32 %v760_v32, %v760_v32 }
  0xbc   : > { %v768_v37 = vsel %vm739_vm4, %v762_v35, 0.0 }
  0xbd   : > { %772 = vadd.xlane.f32.xlu0 %v771_v34  ;;  %769 = vadd.xlane.f32.xlu1 %v768_v37  ;;  %v774_v38 = vsel %vm739_vm4, %v764_v36, 0.0 }
  0xc1   : > { %775 = vadd.xlane.f32.xlu1 %v774_v38 }
 0x146   : > { %v767_v41 = vpop.xlane.xlu0 %766 }
 0x147   : > { %v777_v42 = vmul.f32 0.03125, %v767_v41 }
 0x149   : > { %v781_v43 = vadd.f32 1e-05, %v777_v42 }
 0x14a   : > { %v770_v44 = vpop.xlane.xlu1 %769  ;;  %v773_v45 = vpop.xlane.xlu0 %772 }
 0x14b   : > { %2940 = vrsqrt.f32 %v781_v43  ;;  %v778_v46 = vmul.f32 0.03125, %v770_v44  ;;  %v779_v47 = vmul.f32 0.03125, %v773_v45 }
 0x14d   : > { %v782_v48 = vadd.f32 1e-05, %v778_v46  ;;  %v783_v49 = vadd.f32 1e-05, %v779_v47 }
 0x14e   : > { %v776_v50 = vpop.xlane.xlu1 %775 }
 0x14f   : > { %2942 = vrsqrt.f32 %v782_v48  ;;  %v780_v51 = vmul.f32 0.03125, %v776_v50 }
 0x150   : > { %2944 = vrsqrt.f32 %v783_v49 }
 0x151   : > { %v784_v52 = vadd.f32 1e-05, %v780_v51 }
 0x153   : > { %2946 = vrsqrt.f32 %v784_v52 }
 0x155   : > { %v2941_v53 = vpop.eup %2940 }
 0x156   : > { %v789_v54 = vmul.f32 %v2941_v53, %v757_v23 }
 0x158   : > { %v799_v59 = vmul.f32 %v2635_v55, %v789_v54 }
 0x159   : > { %v2943_v56 = vpop.eup %2942 }
 0x15a   : > { %v2945_v57 = vpop.eup %2944  ;;  %v790_v58 = vmul.f32 %v2943_v56, %v758_v31  ;;  %v809_v1 = vadd.f32 %v2636_v61, %v799_v59 }
 0x15b   : > { %v791_v60 = vmul.f32 %v2945_v57, %v759_v24 }
 0x15c   : > { %v800_v62 = vmul.f32 %v2635_v55, %v790_v58 }
 0x15d   : > { %v2947_v63 = vpop.eup %2946  ;;  %v801_v3 = vmul.f32 %v2635_v55, %v791_v60 }
 0x15e   : > { %v792_v0 = vmul.f32 %v2947_v63, %v760_v32  ;;  %v810_v2 = vadd.f32 %v2636_v61, %v800_v62 }
 0x15f   : > { %v811_v6 = vadd.f32 %v2636_v61, %v801_v3 }
 0x160   : > { %v813_v4 = vpack.c.bf16 %v810_v2, %v809_v1  ;;  %v802_v5 = vmul.f32 %v2635_v55, %v792_v0 }
 0x162   : > { %2749 = vmatprep.mubr.msk.bf16.mxu0 %vm739_vm4, %v813_v4  ;;  %v812_v7 = vadd.f32 %v2636_v61, %v802_v5 }
 0x164   : > { %v814_v8 = vpack.c.bf16 %v812_v7, %v811_v6 }
 0x166   : > { %2750 = vmatmul.mubr.msk.bf16.vlgmr.msra.gmra.mrb[0].mxu0 %vm739_vm4, %v814_v8 }
 0x167   : > { %2755 = vmatprep.mubr.msk.bf16.mxu0 %vm3066_vm5, %v3065_v9 }
 0x239   : > { %v2751_v10 = vpop.f32.mrb[0].mxu0 }
 0x23a   : > { %v878_v12 = vpop.f32.mrb[1].mxu0  ;;  %v887_v14 = vadd.f32 %v2751_v10, %v2637_v11 }
 0x23b   : > { %v2752_v13 = vpop.f32.mrb[2].mxu0  ;;  %v879_v17 = vadd.f32 %v2637_v11, %v878_v12 }
 0x23c   : > { %v890_v15 = vadd.f32 %v2752_v13, %v2637_v11  ;;  %v881_v16 = vpop.f32.mrb[3].mxu0 }
 0x23d   : > { %v882_v18 = vadd.f32 %v2637_v11, %v881_v16 }
 0x23e   : > { %v3309_v19 = vpack.c.bf16 %v890_v15, %v887_v14 }
 0x23f   : > { %v3311_v20 = vpack.c.bf16 %v882_v18, %v879_v17 }
 0x240   : > { %949 = vrot.lane.b32.xlu1 %v3309_v19, %s3067_s16 }
 0x241   : > { %898 = vrot.lane.b32.xlu0 %v3311_v20, %s3067_s16  ;;  %s3079_s16 = smov 16  }
 0x2b2   : > { %v950_v23 = vpop.permute.xlu1 %949 }
 0x2b3   : > { %v899_v21 = vpop.permute.xlu0 %898  ;;  %v955_v24 = vsel %vm900_vm6, %v950_v23, 0 }
 0x2b4   : > { %v905_v22 = vsel %vm900_vm6, %v899_v21, 0 }
 0x2b5   : > { %2754 = vmatpush3.bf16.xpose.msra.mxu0 %v905_v22 }
 0x2b6   : > { %2759 = vmatprep.subr.bf16.mxu0 %v3065_v9 }
 0x2bc   : > { %2756 = vmatmul.mubr.msk.bf16.vlgmr.msra.gmra.mrb[4].mxu0 %vm900_vm6, %v3311_v20 }
 0x2bd   : > { %2760 = vmatpush3.bf16.xpose.msra.mxu0 %v955_v24  ;;  %2761 = vmatprep.mubr.msk.bf16.mxu0 %vm3066_vm5, %v3065_v9 }
 0x2be   : > { %2771 = vmatprep.subr.bf16.mxu0 %v3065_v9 }
 0x2c4   : > { %2762 = vmatmul.mubr.msk.bf16.vlgmr.msra.gmra.mrb[8].mxu0 %vm900_vm6, %v3309_v19 }
 0x2c5   : > { %2773 = vmatprep.mubr.msk.bf16.mxu0 %vm3066_vm5, %v3065_v9 }
 0x38f   : > { %v941_v25 = vpop.f32.mrb[4].mxu0 }
 0x390   : > { %v998_v27 = vmul.f32 0.35355338, %v941_v25  ;;  %v2757_v28 = vpop.f32.mrb[5].mxu0 }
 0x391   : > { %v944_v29 = vpop.f32.mrb[6].mxu0 }
 0x392   : > { %v999_v31 = vmul.f32 0.35355338, %v944_v29  ;;  %v2758_v32 = vpop.f32.mrb[7].mxu0  ;;  %v1002_v33 = vadd.f32 %v998_v27, %v3327_v26 }
 0x394   : > { %v1007_v34 = vsel %vm1006_vm7, %v1002_v33, -inf  ;;  %v1003_v35 = vadd.f32 %v999_v31, %v3329_v30 }
 0x395   : > { %1008 = vmax.xlane.f32.xlu1 %v1007_v34 }
 0x396   : > { %v1010_v36 = vsel %vm1006_vm7, %v1003_v35, -inf }
 0x397   : > { %1011 = vmax.xlane.f32.xlu0 %v1010_v36  ;;  %v991_v37 = vpop.f32.mrb[8].mxu0 }
 0x398   : > { %v1000_v38 = vmul.f32 0.35355338, %v991_v37  ;;  %v2763_v39 = vpop.f32.mrb[9].mxu0 }
 0x399   : > { %v994_v40 = vpop.f32.mrb[10].mxu0 }
 0x39a   : > { %v1001_v41 = vmul.f32 0.35355338, %v994_v40  ;;  %v2764_v42 = vpop.f32.mrb[11].mxu0  ;;  %v1004_v43 = vadd.f32 %v1000_v38, %v3327_v26 }
 0x39c   : > { %v1013_v44 = vsel %vm1006_vm7, %v1004_v43, -inf  ;;  %v1005_v45 = vadd.f32 %v1001_v41, %v3329_v30 }
 0x39d   : > { %1014 = vmax.xlane.f32.xlu0 %v1013_v44 }
 0x39e   : > { %v1016_v46 = vsel %vm1006_vm7, %v1005_v45, -inf }
 0x39f   : > { %1017 = vmax.xlane.f32.xlu1 %v1016_v46 }
 0x422   : > { %v1009_v47 = vpop.xlane.xlu1 %1008 }
 0x423   : > { %v1019_v48 = vsub.f32 %v1002_v33, %v1009_v47 }
 0x424   : > { %v1012_v49 = vpop.xlane.xlu0 %1011 }
 0x425   : > { %v1023_v50 = vmul.f32 1.442695, %v1019_v48  ;;  %v1020_v51 = vsub.f32 %v1003_v35, %v1012_v49 }
 0x427   : > { %2948 = vpow2.f32 %v1023_v50  ;;  %v1025_v52 = vmul.f32 1.442695, %v1020_v51 }
 0x429   : > { %2950 = vpow2.f32 %v1025_v52 }
 0x42a   : > { %v1015_v53 = vpop.xlane.xlu0 %1014 }
 0x42b   : > { %v1021_v54 = vsub.f32 %v1004_v43, %v1015_v53 }
 0x42c   : > { %v1018_v62 = vpop.xlane.xlu1 %1017 }
 0x42d   : > { %v1027_v55 = vmul.f32 1.442695, %v1021_v54  ;;  %v1022_v63 = vsub.f32 %v1005_v45, %v1018_v62 }
 0x42f   : > { %2952 = vpow2.f32 %v1027_v55  ;;  %v1029_v0 = vmul.f32 1.442695, %v1022_v63 }
 0x431   : > { %v2949_v56 = vpop.eup %2948  ;;  %2954 = vpow2.f32 %v1029_v0 }
 0x432   : > { %v1031_v57 = vsel %vm1006_vm7, %v2949_v56, 0.0 }
 0x433   : > { %v2951_v58 = vpop.eup %2950  ;;  %1032 = vadd.xlane.f32.xlu0 %v1031_v57 }
 0x434   : > { %v1034_v59 = vsel %vm1006_vm7, %v2951_v58, 0.0 }
 0x435   : > { %1035 = vadd.xlane.f32.xlu1 %v1034_v59 }
 0x439   : > { %v2953_v60 = vpop.eup %2952 }
 0x43a   : > { %v1037_v61 = vsel %vm1006_vm7, %v2953_v60, 0.0 }
 0x43b   : > { %1038 = vadd.xlane.f32.xlu0 %v1037_v61  ;;  %v2955_v1 = vpop.eup %2954 }
 0x43c   : > { %v1040_v2 = vsel %vm1006_vm7, %v2955_v1, 0.0 }
 0x446   : > { %1100 = vrot.lane.b32.xlu1 %v3309_v19, %s3068_s29 }
 0x44a   : > { %1153 = vrot.lane.b32.xlu1 %v3311_v20, %s3069_s21 }
 0x451   : > { %1053 = vrot.lane.b32.xlu0 %v3311_v20, %s3068_s29  ;;  %s3657_s29 = sld [smem:[#allocation7_spill]] }
 0x455   : > { %1151 = vrot.lane.b32.xlu0 %v3311_v20, %s3070_s23 }
 0x46e   : > { %1041 = vadd.xlane.f32.xlu1 %v1040_v2 }
 0x47f   : > { %1204 = vrot.lane.b32.xlu1 %v3309_v19, %s3069_s21  ;;  %s3080_s21 = smov 24  }
 0x483   : > { %1202 = vrot.lane.b32.xlu1 %v3309_v19, %s3070_s23 }
 0x4c0   : > { %v1033_v3 = vpop.xlane.xlu0 %1032 }
 0x4c1   : > { %2956 = vrcp.f32 %v1033_v3 }
 0x4c2   : > { %v1036_v4 = vpop.xlane.xlu1 %1035 }
 0x4c3   : > { %2958 = vrcp.f32 %v1036_v4 }
 0x4c6   : > { %v1101_v5 = vpop.permute.xlu1 %1100 }
 0x4c7   : > { %2772 = vmatpush3.bf16.msra.mxu0 %v1101_v5 }
 0x4c8   : > { %v1039_v6 = vpop.xlane.xlu0 %1038  ;;  %2783 = vmatprep.subr.bf16.mxu0 %v3065_v9 }
 0x4c9   : > { %2960 = vrcp.f32 %v1039_v6 }
 0x4ca   : > { %v1154_v14 = vpop.permute.xlu1 %1153 }
 0x4cb   : > { %v2957_v7 = vpop.eup %2956  ;;  %v1159_v15 = vsel %vm900_vm6, %v1154_v14, 0 }
 0x4cc   : > { %v1054_v8 = vpop.permute.xlu0 %1053  ;;  %v1047_v11 = vmul.f32 %v2957_v7, %v2949_v56 }
 0x4cd   : > { %v2959_v10 = vpop.eup %2958  ;;  %2766 = vmatpush3.bf16.msra.mxu1 %v1054_v8 }
 0x4ce   : > { %v1048_v12 = vmul.f32 %v2959_v10, %v2951_v58  ;;  %2777 = vmatprep.subr.bf16.mxu1 %v3065_v9 }
 0x4d0   : > { %v1051_v13 = vpack.c.bf16 %v1048_v12, %v1047_v11  ;;  %v1152_v16 = vpop.permute.xlu0 %1151 }
 0x4d2   : > { %2768 = vmatmul.mubr.msk.bf16.vlgmr.msra.gmra.mrb[0].mxu1 %vm1006_vm7, %v1051_v13 }
 0x4d3   : > { %2779 = vmatprep.mubr.msk.bf16.mxu1 %vm3066_vm5, %v3065_v9  ;;  %v2961_v18 = vpop.eup %2960 }
 0x4d4   : > { %v1049_v22 = vmul.f32 %v2961_v18, %v2953_v60 }
 0x4d6   : > { %2778 = vmatpush3.bf16.xpose.msra.mxu1 %v1159_v15 }
 0x4d7   : > { %2789 = vmatprep.subr.bf16.mxu1 %v3065_v9 }
 0x4dd   : > { %2780 = vmatmul.mubr.msk.bf16.vlgmr.msra.gmra.mrb[4].mxu1 %vm900_vm6, %v1152_v16 }
 0x4de   : > { %2791 = vmatprep.mubr.msk.bf16.mxu1 %vm3066_vm5, %v3065_v9 }
 0x4fb   : > { %v1042_v17 = vpop.xlane.xlu1 %1041 }
 0x4fc   : > { %2962 = vrcp.f32 %v1042_v17 }
 0x4ff   : > { %v1205_v24 = vpop.permute.xlu1 %1204 }
 0x500   : > { %v1210_v27 = vsel %vm900_vm6, %v1205_v24, 0 }
 0x503   : > { %v1203_v28 = vpop.permute.xlu1 %1202 }
 0x506   : > { %v2963_v21 = vpop.eup %2962 }
 0x507   : > { %v1050_v23 = vmul.f32 %v2963_v21, %v2955_v1 }
 0x509   : > { %v1052_v25 = vpack.c.bf16 %v1050_v23, %v1049_v22 }
 0x50b   : > { %2774 = vmatmul.mubr.msk.bf16.vlgmr.msra.gmra.mrb[12].mxu0 %vm1006_vm7, %v1052_v25 }
 0x50c   : > { %2784 = vmatpush3.bf16.xpose.msra.mxu0 %v1210_v27  ;;  %2785 = vmatprep.mubr.msk.bf16.mxu0 %vm3066_vm5, %v3065_v9 }
 0x50d   : > { %2795 = vmatprep.subr.bf16.mxu0 %v3065_v9 }
 0x513   : > { %2786 = vmatmul.mubr.msk.bf16.vlgmr.msra.gmra.mrb[16].mxu0 %vm900_vm6, %v1203_v28 }
 0x514   : > { %2797 = vmatprep.mubr.msk.bf16.mxu0 %vm3066_vm5, %v3065_v9 }
 0x5a5   : > { %v1093_v29 = vpop.f32.mrb[0].mxu1 }
 0x5a6   : > { %v2769_v31 = vpop.f32.mrb[1].mxu1 }
 0x5a7   : > { %v1096_v32 = vpop.f32.mrb[2].mxu1 }
 0x5a8   : > { %v1147_v33 = vpack.c.bf16 %v1096_v32, %v1093_v29  ;;  %v2770_v34 = vpop.f32.mrb[3].mxu1 }
 0x5aa   : > { %1149 = vst.msk [vmem:[#allocation3] sm:$0xff] %vm900_vm6, %v1147_v33 }
 0x5b0   : > { %v1195_v35 = vpop.f32.mrb[4].mxu1 }
 0x5b1   : > { %v1253_v36 = vmul.f32 0.35355338, %v1195_v35  ;;  %v2781_v37 = vpop.f32.mrb[5].mxu1 }
 0x5b2   : > { %v1198_v38 = vpop.f32.mrb[6].mxu1 }
 0x5b3   : > { %v1254_v39 = vmul.f32 0.35355338, %v1198_v38  ;;  %v2782_v40 = vpop.f32.mrb[7].mxu1  ;;  %v1257_v41 = vadd.f32 %v1253_v36, %v3327_v26 }
 0x5b5   : > { %v1261_v42 = vsel %vm1006_vm7, %v1257_v41, -inf  ;;  %v1258_v43 = vadd.f32 %v1254_v39, %v3329_v30 }
 0x5b6   : > { %1262 = vmax.xlane.f32.xlu0 %v1261_v42 }
 0x5b7   : > { %v1264_v44 = vsel %vm1006_vm7, %v1258_v43, -inf }
 0x5b8   : > { %1265 = vmax.xlane.f32.xlu1 %v1264_v44 }
 0x5de   : > { %v1140_v45 = vpop.f32.mrb[12].mxu0 }
 0x5df   : > { %v2775_v46 = vpop.f32.mrb[13].mxu0 }
 0x5e0   : > { %v1143_v47 = vpop.f32.mrb[14].mxu0 }
 0x5e1   : > { %v1148_v48 = vpack.c.bf16 %v1143_v47, %v1140_v45  ;;  %v2776_v49 = vpop.f32.mrb[15].mxu0 }
 0x5e3   : > { %1150 = vst.msk [vmem:[#allocation3 + $0x8] sm:$0xff] %vm900_vm6, %v1148_v48 }
 0x5e6   : > { %v1246_v50 = vpop.f32.mrb[16].mxu0 }
 0x5e7   : > { %v1255_v51 = vmul.f32 0.35355338, %v1246_v50  ;;  %v2787_v52 = vpop.f32.mrb[17].mxu0 }
 0x5e8   : > { %v1249_v53 = vpop.f32.mrb[18].mxu0 }
 0x5e9   : > { %v1256_v54 = vmul.f32 0.35355338, %v1249_v53  ;;  %v2788_v55 = vpop.f32.mrb[19].mxu0  ;;  %v1259_v56 = vadd.f32 %v1255_v51, %v3327_v26 }
 0x5eb   : > { %v1267_v57 = vsel %vm1006_vm7, %v1259_v56, -inf  ;;  %v1260_v58 = vadd.f32 %v1256_v54, %v3329_v30 }
 0x5ec   : > { %1268 = vmax.xlane.f32.xlu0 %v1267_v57 }
 0x5ed   : > { %v1270_v59 = vsel %vm1006_vm7, %v1260_v58, -inf }
 0x5f0   : > { %1271 = vmax.xlane.f32.xlu0 %v1270_v59 }
 0x643   : > { %v1263_v60 = vpop.xlane.xlu0 %1262 }
 0x644   : > { %v1273_v61 = vsub.f32 %v1257_v41, %v1263_v60 }
 0x645   : > { %v1266_v62 = vpop.xlane.xlu1 %1265 }
 0x646   : > { %v1277_v63 = vmul.f32 1.442695, %v1273_v61  ;;  %v1274_v0 = vsub.f32 %v1258_v43, %v1266_v62 }
 0x648   : > { %2964 = vpow2.f32 %v1277_v63  ;;  %v1279_v1 = vmul.f32 1.442695, %v1274_v0 }
 0x64a   : > { %2966 = vpow2.f32 %v1279_v1 }
 0x652   : > { %v2965_v2 = vpop.eup %2964 }
 0x653   : > { %v1285_v3 = vsel %vm1006_vm7, %v2965_v2, 0.0 }
 0x654   : > { %v2967_v4 = vpop.eup %2966  ;;  %1286 = vadd.xlane.f32.xlu0 %v1285_v3 }
 0x655   : > { %v1288_v5 = vsel %vm1006_vm7, %v2967_v4, 0.0 }
 0x656   : > { %1289 = vadd.xlane.f32.xlu1 %v1288_v5 }
 0x667   : > { %1354 = vrot.lane.b32.xlu1 %v3309_v19, %s3071_s24 }
 0x66b   : > { %1416 = vrot.lane.b32.xlu1 %v3311_v20, %s3072_s19 }
 0x679   : > { %v1269_v6 = vpop.xlane.xlu0 %1268 }
 0x67a   : > { %v1275_v7 = vsub.f32 %v1259_v56, %v1269_v6 }
 0x67c   : > { %v1281_v8 = vmul.f32 1.442695, %v1275_v7 }
 0x67d   : > { %v1272_v10 = vpop.xlane.xlu0 %1271 }
 0x67e   : > { %2968 = vpow2.f32 %v1281_v8  ;;  %v1276_v11 = vsub.f32 %v1260_v58, %v1272_v10 }
 0x680   : > { %v1283_v12 = vmul.f32 1.442695, %v1276_v11 }
 0x682   : > { %2970 = vpow2.f32 %v1283_v12 }
 0x688   : > { %v2969_v13 = vpop.eup %2968 }
 0x689   : > { %v1291_v14 = vsel %vm1006_vm7, %v2969_v13, 0.0 }
 0x68a   : > { %1292 = vadd.xlane.f32.xlu0 %v1291_v14 }
 0x68c   : > { %v2971_v15 = vpop.eup %2970 }
 0x68d   : > { %v1294_v16 = vsel %vm1006_vm7, %v2971_v15, 0.0 }
 0x68f   : > { %1295 = vadd.xlane.f32.xlu1 %v1294_v16 }
 0x6a0   : > { %1307 = vrot.lane.b32.xlu0 %v3311_v20, %s3071_s24  ;;  %1467 = vrot.lane.b32.xlu1 %v3309_v19, %s3072_s19  ;;  %s3658_s19 = scalar_lea.vmem %s3628_s6, %s3183_s22 }
 0x6a4   : > { %1414 = vrot.lane.b32.xlu0 %v3311_v20, %s3073_s20  ;;  %1465 = vrot.lane.b32.xlu1 %v3309_v19, %s3073_s20 }
 0x6e1   : > { %v1287_v21 = vpop.xlane.xlu0 %1286 }
 0x6e3   : > { %v1290_v17 = vpop.xlane.xlu1 %1289 }
 0x6e4   : > { %2972 = vrcp.f32 %v1290_v17 }
 0x6e5   : > { %2974 = vrcp.f32 %v1287_v21 }
 0x6e7   : > { %v1355_v18 = vpop.permute.xlu1 %1354 }
 0x6e8   : > { %2796 = vmatpush3.bf16.msra.mxu0 %v1355_v18 }
 0x6e9   : > { %2807 = vmatprep.subr.bf16.mxu0 %v3065_v9 }
 0x6eb   : > { %v1417_v25 = vpop.permute.xlu1 %1416 }
 0x6ec   : > { %v1422_v33 = vsel %vm900_vm6, %v1417_v25, 0 }
 0x6ee   : > { %v2973_v22 = vpop.eup %2972 }
 0x6ef   : > { %v2975_v24 = vpop.eup %2974  ;;  %v1302_v27 = vmul.f32 %v2973_v22, %v2967_v4 }
 0x6f0   : > { %v1301_v28 = vmul.f32 %v2975_v24, %v2965_v2 }
 0x6f2   : > { %v1305_v32 = vpack.c.bf16 %v1302_v27, %v1301_v28 }
 0x717   : > { %v1293_v23 = vpop.xlane.xlu0 %1292 }
 0x718   : > { %2976 = vrcp.f32 %v1293_v23 }
 0x71b   : > { %v1308_v29 = vpop.permute.xlu0 %1307 }
 0x71c   : > { %v1296_v31 = vpop.xlane.xlu1 %1295  ;;  %2790 = vmatpush3.bf16.msra.mxu1 %v1308_v29 }
 0x71d   : > { %2978 = vrcp.f32 %v1296_v31  ;;  %2801 = vmatprep.subr.bf16.mxu1 %v3065_v9 }
 0x71f   : > { %2792 = vmatmul.mubr.msk.bf16.vlgmr.msra.gmra.mrb[8].mxu1 %vm1006_vm7, %v1305_v32  ;;  %v1415_v40 = vpop.permute.xlu0 %1414 }
 0x720   : > { %2803 = vmatprep.mubr.msk.bf16.mxu1 %vm3066_vm5, %v3065_v9  ;;  %v1468_v38 = vpop.permute.xlu1 %1467 }
 0x721   : > { %v1473_v41 = vsel %vm900_vm6, %v1468_v38, 0 }
 0x722   : > { %v2977_v34 = vpop.eup %2976 }
 0x723   : > { %v1303_v36 = vmul.f32 %v2977_v34, %v2969_v13 }
 0x724   : > { %v1466_v42 = vpop.permute.xlu1 %1465 }
 0x725   : > { %2802 = vmatpush3.bf16.xpose.msra.mxu1 %v1422_v33 }
 0x726   : > { %2813 = vmatprep.subr.bf16.mxu1 %v3065_v9 }
 0x727   : > { %v2979_v35 = vpop.eup %2978 }
 0x728   : > { %v1304_v37 = vmul.f32 %v2979_v35, %v2971_v15 }
 0x72a   : > { %v1306_v39 = vpack.c.bf16 %v1304_v37, %v1303_v36 }
 0x72c   : > { %2798 = vmatmul.mubr.msk.bf16.vlgmr.msra.gmra.mrb[20].mxu0 %vm1006_vm7, %v1306_v39  ;;  %2804 = vmatmul.mubr.msk.bf16.vlgmr.msra.gmra.mrb[12].mxu1 %vm900_vm6, %v1415_v40 }
 0x72d   : > { %2808 = vmatpush3.bf16.xpose.msra.mxu0 %v1473_v41  ;;  %2809 = vmatprep.mubr.msk.bf16.mxu0 %vm3066_vm5, %v3065_v9 }
 0x72e   : > { %2819 = vmatprep.subr.bf16.mxu0 %v3065_v9  ;;  %2815 = vmatprep.mubr.msk.bf16.mxu1 %vm3066_vm5, %v3065_v9 }
 0x734   : > { %2810 = vmatmul.mubr.msk.bf16.vlgmr.msra.gmra.mrb[24].mxu0 %vm900_vm6, %v1466_v42 }
 0x735   : > { %2821 = vmatprep.mubr.msk.bf16.mxu0 %vm3066_vm5, %v3065_v9 }
 0x7f2   : > { %v3405_v43 = vpop.f32.mrb[8].mxu1 }
 0x7f3   : > { %v2793_v44 = vpop.f32.mrb[9].mxu1 }
 0x7f4   : > { %v3407_v45 = vpop.f32.mrb[10].mxu1 }
 0x7f5   : > { %v1401_v46 = vpack.c.bf16 %v3407_v45, %v3405_v43  ;;  %v2794_v47 = vpop.f32.mrb[11].mxu1 }
 0x7ff   : > { %v3411_v48 = vpop.f32.mrb[20].mxu0  ;;  %v1458_v49 = vpop.f32.mrb[12].mxu1 }
 0x800   : > { %v1516_v50 = vmul.f32 0.35355338, %v1458_v49  ;;  %v2799_v51 = vpop.f32.mrb[21].mxu0  ;;  %v2805_v52 = vpop.f32.mrb[13].mxu1 }
 0x801   : > { %v3413_v53 = vpop.f32.mrb[22].mxu0  ;;  %v1461_v54 = vpop.f32.mrb[14].mxu1 }
 0x802   : > { %v1402_v55 = vpack.c.bf16 %v3413_v53, %v3411_v48  ;;  %v1517_v56 = vmul.f32 0.35355338, %v1461_v54  ;;  %v2800_v57 = vpop.f32.mrb[23].mxu0  ;;  %v2806_v58 = vpop.f32.mrb[15].mxu1  ;;  %v1520_v59 = vadd.f32 %v1516_v50, %v3327_v26 }
 0x804   : > { %v1524_v60 = vsel %vm1006_vm7, %v1520_v59, -inf  ;;  %v1521_v61 = vadd.f32 %v1517_v56, %v3329_v30 }
 0x805   : > { %1525 = vmax.xlane.f32.xlu0 %v1524_v60 }
 0x806   : > { %v1527_v62 = vsel %vm1006_vm7, %v1521_v61, -inf }
 0x807   : > { %1528 = vmax.xlane.f32.xlu1 %v1527_v62  ;;  %v1509_v63 = vpop.f32.mrb[24].mxu0 }
 0x808   : > { %v1518_v0 = vmul.f32 0.35355338, %v1509_v63  ;;  %v2811_v1 = vpop.f32.mrb[25].mxu0 }
 0x809   : > { %v1512_v2 = vpop.f32.mrb[26].mxu0 }
 0x80a   : > { %v1519_v3 = vmul.f32 0.35355338, %v1512_v2  ;;  %v2812_v4 = vpop.f32.mrb[27].mxu0  ;;  %v1522_v5 = vadd.f32 %v1518_v0, %v3327_v26 }
 0x80c   : > { %v1530_v6 = vsel %vm1006_vm7, %v1522_v5, -inf  ;;  %v1523_v7 = vadd.f32 %v1519_v3, %v3329_v30 }
 0x80d   : > { %1531 = vmax.xlane.f32.xlu0 %v1530_v6 }
 0x80e   : > { %v1533_v8 = vsel %vm1006_vm7, %v1523_v7, -inf }
 0x811   : > { %1534 = vmax.xlane.f32.xlu0 %v1533_v8 }
 0x892   : > { %v1526_v10 = vpop.xlane.xlu0 %1525 }
 0x893   : > { %v1536_v11 = vsub.f32 %v1520_v59, %v1526_v10 }
 0x894   : > { %v1529_v12 = vpop.xlane.xlu1 %1528 }
 0x895   : > { %v1540_v13 = vmul.f32 1.442695, %v1536_v11  ;;  %v1537_v14 = vsub.f32 %v1521_v61, %v1529_v12 }
 0x897   : > { %2980 = vpow2.f32 %v1540_v13  ;;  %v1542_v15 = vmul.f32 1.442695, %v1537_v14 }
 0x899   : > { %2982 = vpow2.f32 %v1542_v15 }
 0x89a   : > { %v1532_v16 = vpop.xlane.xlu0 %1531 }
 0x89b   : > { %v1538_v17 = vsub.f32 %v1522_v5, %v1532_v16 }
 0x89d   : > { %v1544_v18 = vmul.f32 1.442695, %v1538_v17 }
 0x89e   : > { %v1535_v28 = vpop.xlane.xlu0 %1534 }
 0x89f   : > { %2984 = vpow2.f32 %v1544_v18  ;;  %v1539_v29 = vsub.f32 %v1523_v7, %v1535_v28 }
 0x8a1   : > { %v2981_v21 = vpop.eup %2980  ;;  %v1546_v31 = vmul.f32 1.442695, %v1539_v29 }
 0x8a2   : > { %v1548_v22 = vsel %vm1006_vm7, %v2981_v21, 0.0 }
 0x8a3   : > { %v2983_v23 = vpop.eup %2982  ;;  %1549 = vadd.xlane.f32.xlu0 %v1548_v22  ;;  %2986 = vpow2.f32 %v1546_v31 }
 0x8a4   : > { %v1551_v24 = vsel %vm1006_vm7, %v2983_v23, 0.0 }
 0x8a5   : > { %1552 = vadd.xlane.f32.xlu1 %v1551_v24 }
 0x8a9   : > { %v2985_v25 = vpop.eup %2984 }
 0x8aa   : > { %v1554_v27 = vsel %vm1006_vm7, %v2985_v25, 0.0 }
 0x8ab   : > { %1555 = vadd.xlane.f32.xlu0 %v1554_v27 }
 0x8ad   : > { %v2987_v32 = vpop.eup %2986 }
 0x8ae   : > { %v1557_v33 = vsel %vm1006_vm7, %v2987_v32, 0.0 }
 0x8b6   : > { %1617 = vrot.lane.b32.xlu1 %v3309_v19, %s3074_s14 }
 0x8ba   : > { %1679 = vrot.lane.b32.xlu1 %v3311_v20, %s3075_s13 }
 0x8c1   : > { %1570 = vrot.lane.b32.xlu0 %v3311_v20, %s3074_s14 }
 0x8c5   : > { %1677 = vrot.lane.b32.xlu0 %v3311_v20, %s3076_s25 }
 0x8de   : > { %1558 = vadd.xlane.f32.xlu1 %v1557_v33 }
 0x8ef   : > { %1730 = vrot.lane.b32.xlu1 %v3309_v19, %s3075_s13 }
 0x8f3   : > { %1728 = vrot.lane.b32.xlu1 %v3309_v19, %s3076_s25 }
 0x930   : > { %v1550_v34 = vpop.xlane.xlu0 %1549 }
 0x931   : > { %2988 = vrcp.f32 %v1550_v34 }
 0x932   : > { %v1553_v35 = vpop.xlane.xlu1 %1552 }
 0x933   : > { %2990 = vrcp.f32 %v1553_v35 }
 0x936   : > { %v1618_v36 = vpop.permute.xlu1 %1617 }
 0x937   : > { %2820 = vmatpush3.bf16.msra.mxu0 %v1618_v36 }
 0x938   : > { %v1556_v37 = vpop.xlane.xlu0 %1555  ;;  %2831 = vmatprep.subr.bf16.mxu0 %v3065_v9 }
 0x939   : > { %2992 = vrcp.f32 %v1556_v37 }
 0x93a   : > { %v1680_v47 = vpop.permute.xlu1 %1679 }
 0x93b   : > { %v2989_v38 = vpop.eup %2988  ;;  %v1685_v49 = vsel %vm900_vm6, %v1680_v47, 0 }
 0x93c   : > { %v1571_v39 = vpop.permute.xlu0 %1570  ;;  %v1564_v41 = vmul.f32 %v2989_v38, %v2981_v21 }
 0x93d   : > { %v2991_v40 = vpop.eup %2990  ;;  %2814 = vmatpush3.bf16.msra.mxu1 %v1571_v39 }
 0x93e   : > { %v1565_v42 = vmul.f32 %v2991_v40, %v2983_v23  ;;  %2825 = vmatprep.subr.bf16.mxu1 %v3065_v9 }
 0x940   : > { %v1568_v44 = vpack.c.bf16 %v1565_v42, %v1564_v41  ;;  %v1678_v50 = vpop.permute.xlu0 %1677 }
 0x942   : > { %2816 = vmatmul.mubr.msk.bf16.vlgmr.msra.gmra.mrb[16].mxu1 %vm1006_vm7, %v1568_v44 }
 0x943   : > { %2827 = vmatprep.mubr.msk.bf16.mxu1 %vm3066_vm5, %v3065_v9  ;;  %v2993_v52 = vpop.eup %2992 }
 0x944   : > { %v1566_v56 = vmul.f32 %v2993_v52, %v2985_v25 }
 0x946   : > { %2826 = vmatpush3.bf16.xpose.msra.mxu1 %v1685_v49 }
 0x947   : > { %2837 = vmatprep.subr.bf16.mxu1 %v3065_v9 }
 0x94d   : > { %2828 = vmatmul.mubr.msk.bf16.vlgmr.msra.gmra.mrb[20].mxu1 %vm900_vm6, %v1678_v50 }
 0x94e   : > { %2839 = vmatprep.mubr.msk.bf16.mxu1 %vm3066_vm5, %v3065_v9 }
 0x96b   : > { %v1559_v51 = vpop.xlane.xlu1 %1558 }
 0x96c   : > { %2994 = vrcp.f32 %v1559_v51 }
 0x96f   : > { %v1731_v58 = vpop.permute.xlu1 %1730 }
 0x970   : > { %v1736_v60 = vsel %vm900_vm6, %v1731_v58, 0 }
 0x973   : > { %v1729_v61 = vpop.permute.xlu1 %1728 }
 0x976   : > { %v2995_v54 = vpop.eup %2994 }
 0x977   : > { %v1567_v57 = vmul.f32 %v2995_v54, %v2987_v32 }
 0x979   : > { %v1569_v59 = vpack.c.bf16 %v1567_v57, %v1566_v56 }
 0x97b   : > { %2822 = vmatmul.mubr.msk.bf16.vlgmr.msra.gmra.mrb[28].mxu0 %vm1006_vm7, %v1569_v59 }
 0x97c   : > { %2832 = vmatpush3.bf16.xpose.msra.mxu0 %v1736_v60  ;;  %2833 = vmatprep.mubr.msk.bf16.mxu0 %vm3066_vm5, %v3065_v9 }
 0x97d   : > { %2843 = vmatprep.subr.bf16.mxu0 %v3065_v9 }
 0x983   : > { %2834 = vmatmul.mubr.msk.bf16.vlgmr.msra.gmra.mrb[32].mxu0 %vm900_vm6, %v1729_v61 }
 0x984   : > { %2845 = vmatprep.mubr.msk.bf16.mxu0 %vm3066_vm5, %v3065_v9 }
 0xa15   : > { %v3453_v62 = vpop.f32.mrb[16].mxu1 }
 0xa16   : > { %v2817_v63 = vpop.f32.mrb[17].mxu1 }
 0xa17   : > { %v3455_v0 = vpop.f32.mrb[18].mxu1 }
 0xa18   : > { %v1664_v1 = vpack.c.bf16 %v3455_v0, %v3453_v62  ;;  %v2818_v2 = vpop.f32.mrb[19].mxu1 }
 0xa20   : > { %v1721_v3 = vpop.f32.mrb[20].mxu1 }
 0xa21   : > { %v1779_v4 = vmul.f32 0.35355338, %v1721_v3  ;;  %v2829_v5 = vpop.f32.mrb[21].mxu1 }
 0xa22   : > { %v1724_v6 = vpop.f32.mrb[22].mxu1 }
 0xa23   : > { %v1780_v7 = vmul.f32 0.35355338, %v1724_v6  ;;  %v2830_v8 = vpop.f32.mrb[23].mxu1  ;;  %v1783_v10 = vadd.f32 %v1779_v4, %v3327_v26 }
 0xa25   : > { %v1787_v11 = vsel %vm1006_vm7, %v1783_v10, -inf  ;;  %v1784_v9 = vadd.f32 %v1780_v7, %v3329_v30 }
 0xa26   : > { %1788 = vmax.xlane.f32.xlu0 %v1787_v11  ;;  %v2929_v11 = vld [vmem:[%s3657_s29 + $0x8] sm:$0xff]  }
 0xa27   : > { %v1790_v12 = vsel %vm1006_vm7, %v1784_v9, -inf }
 0xa28   : > { %1791 = vmax.xlane.f32.xlu1 %v1790_v12 }
 0xa4e   : > { %v1657_v13 = vpop.f32.mrb[28].mxu0 }
 0xa4f   : > { %v2823_v14 = vpop.f32.mrb[29].mxu0 }
 0xa50   : > { %v1660_v15 = vpop.f32.mrb[30].mxu0 }
 0xa51   : > { %v1665_v16 = vpack.c.bf16 %v1660_v15, %v1657_v13  ;;  %v2824_v17 = vpop.f32.mrb[31].mxu0 }
 0xa56   : > { %v1772_v18 = vpop.f32.mrb[32].mxu0 }
 0xa57   : > { %v1781_v21 = vmul.f32 0.35355338, %v1772_v18  ;;  %v2835_v22 = vpop.f32.mrb[33].mxu0 }
 0xa58   : > { %v1775_v23 = vpop.f32.mrb[34].mxu0 }
 0xa59   : > { %v1782_v24 = vmul.f32 0.35355338, %v1775_v23  ;;  %v2836_v25 = vpop.f32.mrb[35].mxu0  ;;  %v1785_v27 = vadd.f32 %v1781_v21, %v3327_v26  ;;  %v2662_v23 = vld [vmem:[%s3658_s19] ss:$0 sm:$0xff] }
 0xa5a   : > { %v3028_v25 = vld [vmem:[%s3637_s15 + $0x10] sm:$0xff] }
 0xa5b   : > { %v1793_v28 = vsel %vm1006_vm7, %v1785_v27, -inf  ;;  %v1786_v29 = vadd.f32 %v1782_v24, %v3329_v30 }
 0xa5c   : > { %1794 = vmax.xlane.f32.xlu0 %v1793_v28  ;;  %v3029_v28 = vld [vmem:[%s3637_s15] sm:$0xff] }
 0xa5d   : > { %v1796_v31 = vsel %vm1006_vm7, %v1786_v29, -inf }
 0xa60   : > { %1797 = vmax.xlane.f32.xlu0 %v1796_v31 }
 0xab3   : > { %v1789_v32 = vpop.xlane.xlu0 %1788 }
 0xab4   : > { %v1799_v33 = vsub.f32 %v1783_v10, %v1789_v32  ;;  %v2928_v10 = vld [vmem:[%s3657_s29] sm:$0xff]  }
 0xab5   : > { %v1792_v34 = vpop.xlane.xlu1 %1791 }
 0xab6   : > { %v1803_v35 = vmul.f32 1.442695, %v1799_v33  ;;  %v1800_v36 = vsub.f32 %v1784_v9, %v1792_v34  ;;  %v3030_v34 = vld [vmem:[%s3637_s15 + $0x8] sm:$0xff] }
 0xab8   : > { %2996 = vpow2.f32 %v1803_v35  ;;  %v1805_v37 = vmul.f32 1.442695, %v1800_v36 }
 0xaba   : > { %2998 = vpow2.f32 %v1805_v37  ;;  %v3031_v37 = vld [vmem:[%s3637_s15 + $0x18] sm:$0xff] }
 0xac2   : > { %v2997_v38 = vpop.eup %2996 }
 0xac3   : > { %v1811_v39 = vsel %vm1006_vm7, %v2997_v38, 0.0 }
 0xac4   : > { %v2999_v26 = vpop.eup %2998  ;;  %1812 = vadd.xlane.f32.xlu0 %v1811_v39 }
 0xac5   : > { %v1814_v40 = vsel %vm1006_vm7, %v2999_v26, 0.0 }
 0xac6   : > { %1815 = vadd.xlane.f32.xlu1 %v1814_v40 }
 0xae9   : > { %v1795_v30 = vpop.xlane.xlu0 %1794 }
 0xaea   : > { %v1801_v41 = vsub.f32 %v1785_v27, %v1795_v30 }
 0xaec   : > { %v1807_v42 = vmul.f32 1.442695, %v1801_v41 }
 0xaed   : > { %v1798_v44 = vpop.xlane.xlu0 %1797 }
 0xaee   : > { %3000 = vpow2.f32 %v1807_v42  ;;  %v1802_v47 = vsub.f32 %v1786_v29, %v1798_v44 }
 0xaf0   : > { %v1809_v49 = vmul.f32 1.442695, %v1802_v47 }
 0xaf2   : > { %3002 = vpow2.f32 %v1809_v49 }
 0xaf8   : > { %v3001_v50 = vpop.eup %3000 }
 0xaf9   : > { %v1817_v51 = vsel %vm1006_vm7, %v3001_v50, 0.0 }
 0xafa   : > { %1818 = vadd.xlane.f32.xlu0 %v1817_v51 }
 0xafc   : > { %v3003_v52 = vpop.eup %3002 }
 0xafd   : > { %v1820_v54 = vsel %vm1006_vm7, %v3003_v52, 0.0 }
 0xafe   : > { %1821 = vadd.xlane.f32.xlu1 %v1820_v54 }
 0xb0f   : > { %1880 = vrot.lane.b32.xlu1 %v3309_v19, %s3077_s28 }
 0xb10   : > { %1833 = vrot.lane.b32.xlu0 %v3311_v20, %s3077_s28 }
 0xb13   : > { %1405 = vrot.lane.b32.xlu1 %v1401_v46, %s3078_s27 }
 0xb14   : > { %1668 = vrot.lane.b32.xlu0 %v1664_v1, %s3079_s16 }
 0xb17   : > { %1407 = vrot.lane.b32.xlu1 %v1402_v55, %s3078_s27 }
 0xb1b   : > { %1670 = vrot.lane.b32.xlu1 %v1665_v16, %s3079_s16 }
 0xb51   : > { %v1813_v57 = vpop.xlane.xlu0 %1812 }
 0xb53   : > { %v1816_v56 = vpop.xlane.xlu1 %1815 }
 0xb54   : > { %3004 = vrcp.f32 %v1816_v56 }
 0xb55   : > { %3006 = vrcp.f32 %v1813_v57 }
 0xb5e   : > { %v3005_v19 = vpop.eup %3004 }
 0xb5f   : > { %v3007_v58 = vpop.eup %3006  ;;  %v1828_v59 = vmul.f32 %v3005_v19, %v2999_v26 }
 0xb60   : > { %v1827_v43 = vmul.f32 %v3007_v58, %v2997_v38 }
 0xb62   : > { %v1831_v60 = vpack.c.bf16 %v1828_v59, %v1827_v43 }
 0xb87   : > { %v1819_v20 = vpop.xlane.xlu0 %1818 }
 0xb88   : > { %3008 = vrcp.f32 %v1819_v20 }
 0xb8b   : > { %v1822_v45 = vpop.xlane.xlu1 %1821  ;;  %v1834_v46 = vpop.permute.xlu0 %1833 }
 0xb8c   : > { %3010 = vrcp.f32 %v1822_v45  ;;  %2838 = vmatpush3.bf16.msra.mxu1 %v1834_v46 }
 0xb8d   : > { %2849 = vmatprep.subr.bf16.mxu1 %v2928_v10 }
 0xb8f   : > { %v1881_v61 = vpop.permute.xlu1 %1880  ;;  %2840 = vmatmul.mubr.msk.bf16.vlgmr.msra.gmra.mrb[24].mxu1 %vm1006_vm7, %v1831_v60  ;;  %v1669_v55 = vpop.permute.xlu0 %1668 }
 0xb90   : > { %2844 = vmatpush3.bf16.msra.mxu0 %v1881_v61  ;;  %2850 = vmatpush3.bf16.msra.mxu1 %v2928_v10 }
 0xb91   : > { %2851 = vmatprep.subr.bf16.mxu1 %v2929_v11 }
 0xb92   : > { %v3009_v53 = vpop.eup %3008 }
 0xb93   : > { %v1406_v48 = vpop.permute.xlu1 %1405  ;;  %v1829_v63 = vmul.f32 %v3009_v53, %v3001_v50 }
 0xb94   : > { %1412 = vst.msk [vmem:[#allocation3] sm:$0xff] %vm1411_vm8, %v1406_v48  ;;  %2852 = vmatpush3.bf16.msra.mxu1 %v2929_v11 }
 0xb95   : > { %1675 = vst.msk [vmem:[#allocation3] sm:$0xff] %vm1674_vm9, %v1669_v55  ;;  %v2930_v55 = vld [vmem:[%s3223_s3] sm:$0xff]  }
 0xb96   : > { %v3011_v62 = vpop.eup %3010  ;;  %2857 = vmatprep.subr.bf16.mxu0 %v2930_v55 }
 0xb97   : > { %v1830_v0 = vmul.f32 %v3011_v62, %v3003_v52  ;;  %v1408_v1 = vpop.permute.xlu1 %1407  ;;  %v2931_v62 = vld [vmem:[%s3223_s3 + $0x8] sm:$0xff]  }
 0xb98   : > { %1413 = vst.msk [vmem:[#allocation3 + $0x8] sm:$0xff] %vm1411_vm8, %v1408_v1 }
 0xb99   : > { %v1832_v2 = vpack.c.bf16 %v1830_v0, %v1829_v63 }
 0xb9b   : > { %v1671_v3 = vpop.permute.xlu1 %1670  ;;  %2846 = vmatmul.mubr.msk.bf16.vlgmr.msra.gmra.mrb[36].mxu0 %vm1006_vm7, %v1832_v2 }
 0xb9c   : > { %1676 = vst.msk [vmem:[#allocation3 + $0x8] sm:$0xff] %vm1674_vm9, %v1671_v3  ;;  %2858 = vmatpush3.bf16.msra.mxu0 %v2930_v55 }
 0xb9d   : > { %2859 = vmatprep.subr.bf16.mxu0 %v2931_v62 }
 0xba0   : > { %2860 = vmatpush3.bf16.msra.mxu0 %v2931_v62 }
 0xc62   : > { %v1873_v4 = vpop.f32.mrb[24].mxu1 }
 0xc63   : > { %v2841_v5 = vpop.f32.mrb[25].mxu1 }
 0xc64   : > { %v1876_v6 = vpop.f32.mrb[26].mxu1 }
 0xc65   : > { %v1927_v7 = vpack.c.bf16 %v1876_v6, %v1873_v4  ;;  %v2842_v8 = vpop.f32.mrb[27].mxu1 }
 0xc67   : > { %1931 = vrot.lane.b32.xlu0 %v1927_v7, %s3080_s21 }
 0xc6e   : > { %v1920_v9 = vpop.f32.mrb[36].mxu0 }
 0xc6f   : > { %v2847_v12 = vpop.f32.mrb[37].mxu0 }
 0xc70   : > { %v1923_v13 = vpop.f32.mrb[38].mxu0  ;;  %v2663_v12 = vld [vmem:[%s680_s2] ss:$0 sm:$0xff] }
 0xc71   : > { %v1928_v14 = vpack.c.bf16 %v1923_v13, %v1920_v9  ;;  %v2848_v15 = vpop.f32.mrb[39].mxu0 }
 0xc73   : > { %1933 = vrot.lane.b32.xlu1 %v1928_v14, %s3080_s21 }
 0xcd9   : > { %v1932_v16 = vpop.permute.xlu0 %1931 }
 0xcda   : > { %1938 = vst.msk [vmem:[#allocation3] sm:$0xff] %vm1937_vm10, %v1932_v16 }
 0xce1   : > { %v1940_v17 = vld [vmem:[#allocation3] sm:$0xff] }
 0xce2   : > { %2853 = vmatprep.mubr.msk.bf16.mxu1 %vm739_vm4, %v1940_v17 }
 0xce5   : > { %v1934_v18 = vpop.permute.xlu1 %1933 }
 0xce6   : > { %1939 = vst.msk [vmem:[#allocation3 + $0x8] sm:$0xff] %vm1937_vm10, %v1934_v18  ;;  %v2664_v18 = vld [vmem:[%s683_s17] ss:$0 sm:$0xff] }
 0xced   : > { %v1941_v21 = vld [vmem:[#allocation3 + $0x8] sm:$0xff] }
 0xcee   : > { %2854 = vmatmul.mubr.msk.bf16.vlgmr.msra.gmra.mrb[28].mxu1 %vm739_vm4, %v1941_v21 }
 0xdc1   : > { %v2855_v22 = vpop.f32.mrb[28].mxu1 }
 0xdc2   : > { %v1998_v24 = vpop.f32.mrb[29].mxu1  ;;  %v2015_v27 = vadd.f32 %v3028_v25, %v2855_v22 }
 0xdc3   : > { %v2013_v29 = vadd.f32 %v3029_v28, %v1998_v24  ;;  %v2856_v31 = vpop.f32.mrb[30].mxu1 }
 0xdc4   : > { %v2001_v32 = vpop.f32.mrb[31].mxu1  ;;  %v3504_v36 = vadd.f32 %v2662_v23, %v2015_v27  ;;  %v2016_v38 = vadd.f32 %v3031_v37, %v2856_v31  ;;  %v2932_v37 = vld [vmem:[%s3233_s26] sm:$0xff]  }
 0xdc5   : > { %v3499_v33 = vadd.f32 %v2662_v23, %v2013_v29  ;;  %v2014_v35 = vadd.f32 %v3030_v34, %v2001_v32  ;;  %2865 = vmatprep.subr.bf16.mxu1 %v2932_v37 }
 0xdc6   : > { %v3515_v30 = vadd.f32 %v2662_v23, %v2016_v38  ;;  %v2036_v41 = vsel %vm739_vm4, %v3504_v36, 0.0  ;;  %2866 = vmatpush3.bf16.msra.mxu1 %v2932_v37  ;;  %v2933_v38 = vld [vmem:[%s3233_s26 + $0x8] sm:$0xff]  }
 0xdc7   : > { %v3509_v39 = vadd.f32 %v2662_v23, %v2014_v35  ;;  %v2030_v26 = vsel %vm739_vm4, %v3499_v33, 0.0  ;;  %2867 = vmatprep.subr.bf16.mxu1 %v2933_v38 }
 0xdc8   : > { %2031 = vadd.xlane.f32.xlu0 %v2030_v26  ;;  %v2039_v42 = vsel %vm739_vm4, %v3515_v30, 0.0  ;;  %v2934_v26 = vld [vmem:[%s3233_s26 + $0x10] sm:$0xff]  }
 0xdc9   : > { %v2033_v40 = vsel %vm739_vm4, %v3509_v39, 0.0 }
 0xdca   : > { %2034 = vadd.xlane.f32.xlu1 %v2033_v40  ;;  %2868 = vmatpush3.bf16.msra.mxu1 %v2933_v38  ;;  %v2935_v40 = vld [vmem:[%s3233_s26 + $0x18] sm:$0xff]  }
 0xdcb   : > { %2869 = vmatprep.subr.bf16.mxu1 %v2934_v26 }
 0xdcc   : > { %2037 = vadd.xlane.f32.xlu0 %v2036_v41  ;;  %v2936_v41 = vld [vmem:[%s3233_s26 + $0x20] sm:$0xff]  }
 0xdce   : > { %2870 = vmatpush3.bf16.msra.mxu1 %v2934_v26 }
 0xdcf   : > { %2871 = vmatprep.subr.bf16.mxu1 %v2935_v40 }
 0xdd0   : > { %2040 = vadd.xlane.f32.xlu0 %v2039_v42  ;;  %v2937_v42 = vld [vmem:[%s3233_s26 + $0x28] sm:$0xff]  }
 0xdd2   : > { %2872 = vmatpush3.bf16.msra.mxu1 %v2935_v40 }
 0xdd3   : > { %2873 = vmatprep.subr.bf16.mxu1 %v2936_v41 }
 0xdd6   : > { %2874 = vmatpush3.bf16.msra.mxu1 %v2936_v41 }
 0xdd7   : > { %2875 = vmatprep.subr.bf16.mxu1 %v2937_v42 }
 0xdda   : > { %2876 = vmatpush3.bf16.msra.mxu1 %v2937_v42 }
 0xe55   : > { %v2032_v44 = vpop.xlane.xlu0 %2031 }
 0xe56   : > { %v2042_v47 = vmul.f32 0.03125, %v2032_v44  ;;  %v2938_v44 = vld [vmem:[%s3233_s26 + $0x30] sm:$0xff]  }
 0xe57   : > { %v2035_v49 = vpop.xlane.xlu1 %2034  ;;  %2877 = vmatprep.subr.bf16.mxu1 %v2938_v44 }
 0xe58   : > { %v2046_v50 = vsub.f32 %v3499_v33, %v2042_v47  ;;  %v2043_v51 = vmul.f32 0.03125, %v2035_v49  ;;  %2878 = vmatpush3.bf16.msra.mxu1 %v2938_v44  ;;  %v2939_v47 = vld [vmem:[%s3233_s26 + $0x38] sm:$0xff]   ;;  %v2665_v49 = vld [vmem:[%s691_s5] ss:$0 sm:$0xff] }
 0xe59   : > { %v2038_v52 = vpop.xlane.xlu0 %2037  ;;  %2879 = vmatprep.subr.bf16.mxu1 %v2939_v47 }
 0xe5a   : > { %v2047_v54 = vsub.f32 %v3509_v39, %v2043_v51  ;;  %v2044_v56 = vmul.f32 0.03125, %v2038_v52  ;;  %v2050_v57 = vmul.f32 %v2046_v50, %v2046_v50 }
 0xe5c   : > { %v2048_v19 = vsub.f32 %v3504_v36, %v2044_v56  ;;  %v2054_v20 = vsel %vm739_vm4, %v2050_v57, 0.0  ;;  %v2051_v58 = vmul.f32 %v2047_v54, %v2047_v54  ;;  %2880 = vmatpush3.bf16.msra.mxu1 %v2939_v47 }
 0xe5d   : > { %2055 = vadd.xlane.f32.xlu0 %v2054_v20  ;;  %v2041_v59 = vpop.xlane.xlu0 %2040 }
 0xe5e   : > { %v2045_v43 = vmul.f32 0.03125, %v2041_v59  ;;  %v2057_v45 = vsel %vm739_vm4, %v2051_v58, 0.0  ;;  %v2052_v46 = vmul.f32 %v2048_v19, %v2048_v19 }
 0xe5f   : > { %2058 = vadd.xlane.f32.xlu1 %v2057_v45 }
 0xe60   : > { %v2049_v60 = vsub.f32 %v3515_v30, %v2045_v43  ;;  %v2060_v61 = vsel %vm739_vm4, %v2052_v46, 0.0 }
 0xe61   : > { %2061 = vadd.xlane.f32.xlu0 %v2060_v61 }
 0xe62   : > { %v2053_v48 = vmul.f32 %v2049_v60, %v2049_v60 }
 0xe64   : > { %v2063_v53 = vsel %vm739_vm4, %v2053_v48, 0.0 }
 0xe65   : > { %2064 = vadd.xlane.f32.xlu1 %v2063_v53 }
 0xeea   : > { %v2056_v63 = vpop.xlane.xlu0 %2055 }
 0xeeb   : > { %v2066_v0 = vmul.f32 0.03125, %v2056_v63 }
 0xeec   : > { %v2059_v1 = vpop.xlane.xlu1 %2058 }
 0xeed   : > { %v2070_v2 = vadd.f32 1e-05, %v2066_v0  ;;  %v2067_v3 = vmul.f32 0.03125, %v2059_v1 }
 0xeee   : > { %v2062_v4 = vpop.xlane.xlu0 %2061 }
 0xeef   : > { %3012 = vrsqrt.f32 %v2070_v2  ;;  %v2071_v5 = vadd.f32 1e-05, %v2067_v3  ;;  %v2068_v6 = vmul.f32 0.03125, %v2062_v4 }
 0xef1   : > { %3014 = vrsqrt.f32 %v2071_v5  ;;  %v2072_v7 = vadd.f32 1e-05, %v2068_v6 }
 0xef2   : > { %v2065_v8 = vpop.xlane.xlu1 %2064 }
 0xef3   : > { %3016 = vrsqrt.f32 %v2072_v7  ;;  %v2069_v10 = vmul.f32 0.03125, %v2065_v8 }
 0xef5   : > { %v2073_v11 = vadd.f32 1e-05, %v2069_v10 }
 0xef7   : > { %3018 = vrsqrt.f32 %v2073_v11 }
 0xef9   : > { %v3013_v9 = vpop.eup %3012 }
 0xefa   : > { %v2078_v13 = vmul.f32 %v3013_v9, %v2046_v50 }
 0xefb   : > { %v3015_v14 = vpop.eup %3014 }
 0xefc   : > { %v2079_v15 = vmul.f32 %v3015_v14, %v2047_v54  ;;  %v2088_v16 = vmul.f32 %v2663_v12, %v2078_v13 }
 0xefd   : > { %v3017_v17 = vpop.eup %3016 }
 0xefe   : > { %v2080_v21 = vmul.f32 %v3017_v17, %v2048_v19  ;;  %v2089_v22 = vmul.f32 %v2663_v12, %v2079_v15  ;;  %v2098_v23 = vadd.f32 %v2664_v18, %v2088_v16 }
 0xf00   : > { %v2099_v24 = vadd.f32 %v2664_v18, %v2089_v22  ;;  %v2090_v27 = vmul.f32 %v2663_v12, %v2080_v21 }
 0xf01   : > { %v3019_v25 = vpop.eup %3018 }
 0xf02   : > { %v2081_v28 = vmul.f32 %v3019_v25, %v2049_v60  ;;  %v2102_v29 = vpack.c.bf16 %v2099_v24, %v2098_v23  ;;  %v2100_v32 = vadd.f32 %v2664_v18, %v2090_v27 }
 0xf04   : > { %v2091_v31 = vmul.f32 %v2663_v12, %v2081_v28  ;;  %2861 = vmatprep.mubr.msk.bf16.mxu0 %vm739_vm4, %v2102_v29  ;;  %v2670_v29 = vld [vmem:[%s699_s30] ss:$0 sm:$0xff] }
 0xf06   : > { %v2101_v34 = vadd.f32 %v2664_v18, %v2091_v31 }
 0xf08   : > { %v2103_v35 = vpack.c.bf16 %v2101_v34, %v2100_v32 }
 0xf0a   : > { %2862 = vmatmul.mubr.msk.bf16.vlgmr.msra.gmra.mrb[40].mxu0 %vm739_vm4, %v2103_v35 }
 0xfdd   : > { %v2863_v50 = vpop.f32.mrb[40].mxu0 }
 0xfde   : > { %v2176_v51 = vadd.f32 %v2863_v50, %v2665_v49  ;;  %v2167_v52 = vpop.f32.mrb[41].mxu0 }
 0xfdf   : > { %v2168_v54 = vadd.f32 %v2665_v49, %v2167_v52  ;;  %v2864_v56 = vpop.f32.mrb[42].mxu0 }
 0xfe0   : > { %v2184_v57 = vmul.f32 %v2176_v51, %v2176_v51  ;;  %v2179_v19 = vadd.f32 %v2864_v56, %v2665_v49  ;;  %v2170_v20 = vpop.f32.mrb[43].mxu0 }
 0xfe1   : > { %v2182_v58 = vmul.f32 %v2168_v54, %v2168_v54  ;;  %v2171_v59 = vadd.f32 %v2665_v49, %v2170_v20 }
 0xfe2   : > { %v2188_v43 = vmul.f32 %v2184_v57, %v2176_v51  ;;  %v2185_v45 = vmul.f32 %v2179_v19, %v2179_v19 }
 0xfe3   : > { %v2186_v46 = vmul.f32 %v2182_v58, %v2168_v54  ;;  %v2183_v60 = vmul.f32 %v2171_v59, %v2171_v59 }
 0xfe4   : > { %v2192_v61 = vmul.f32 0.044715, %v2188_v43  ;;  %v2189_v48 = vmul.f32 %v2185_v45, %v2179_v19 }
 0xfe5   : > { %v2190_v53 = vmul.f32 0.044715, %v2186_v46  ;;  %v2187_v55 = vmul.f32 %v2183_v60, %v2171_v59 }
 0xfe6   : > { %v2196_v62 = vadd.f32 %v2192_v61, %v2176_v51  ;;  %v2193_v63 = vmul.f32 0.044715, %v2189_v48 }
 0xfe7   : > { %v2194_v0 = vadd.f32 %v2190_v53, %v2168_v54  ;;  %v2191_v1 = vmul.f32 0.044715, %v2187_v55 }
 0xfe8   : > { %v2200_v2 = vmul.f32 0.7978846, %v2196_v62  ;;  %v2197_v3 = vadd.f32 %v2193_v63, %v2179_v19 }
 0xfe9   : > { %v2198_v4 = vmul.f32 0.7978846, %v2194_v0  ;;  %v2195_v5 = vadd.f32 %v2191_v1, %v2171_v59 }
 0xfea   : > { %3020 = vtanh.f32 %v2200_v2  ;;  %v2201_v6 = vmul.f32 0.7978846, %v2197_v3 }
 0xfeb   : > { %3022 = vtanh.f32 %v2198_v4  ;;  %v2199_v7 = vmul.f32 0.7978846, %v2195_v5 }
 0xfec   : > { %3024 = vtanh.f32 %v2201_v6 }
 0xfed   : > { %3026 = vtanh.f32 %v2199_v7 }
 0xff4   : > { %v3021_v8 = vpop.eup %3020 }
 0xff5   : > { %v3023_v10 = vpop.eup %3022  ;;  %v2208_v11 = vadd.f32 1.0, %v3021_v8 }
 0xff6   : > { %v3025_v9 = vpop.eup %3024  ;;  %v2206_v12 = vadd.f32 1.0, %v3023_v10 }
 0xff7   : > { %v3027_v13 = vpop.eup %3026  ;;  %v2212_v14 = vmul.f32 0.5, %v2208_v11  ;;  %v2209_v15 = vadd.f32 1.0, %v3025_v9 }
 0xff8   : > { %v2207_v16 = vadd.f32 1.0, %v3027_v13  ;;  %v2210_v17 = vmul.f32 0.5, %v2206_v12 }
 0xff9   : > { %v2213_v18 = vmul.f32 0.5, %v2209_v15  ;;  %v2216_v22 = vmul.f32 %v2212_v14, %v2176_v51 }
 0xffa   : > { %v2211_v21 = vmul.f32 0.5, %v2207_v16  ;;  %v2214_v24 = vmul.f32 %v2210_v17, %v2168_v54 }
 0xffb   : > { %v2217_v23 = vmul.f32 %v2213_v18, %v2179_v19 }
 0xffc   : > { %v2215_v25 = vmul.f32 %v2211_v21, %v2171_v59 }
 0xffd   : > { %v2219_v27 = vpack.c.bf16 %v2217_v23, %v2216_v22 }
 0xffe   : > { %v2218_v28 = vpack.c.bf16 %v2215_v25, %v2214_v24 }
0x1000   : > { %2881 = vmatprep.mubr.bf16.mxu1 %v2218_v28 }
0x1001   : > { %2882 = vmatmul.mubr.bf16.vlgmr.msra.gmra.mrb[32].mxu1 %v2219_v27 }
0x10d4   : > { %v2883_v31 = vpop.f32.mrb[32].mxu1  ;;  %2347 = sbr.rel (%p2679_p6) target bundleno = 4317 (0x10dd), region = 88 }
0x10d5   : > { %v2334_v32 = vadd.f32 %v2883_v31, %v2670_v29  ;;  %v2325_v34 = vpop.f32.mrb[33].mxu1 }
0x10d6   : > { %v2326_v35 = vadd.f32 %v2670_v29, %v2325_v34  ;;  %v2884_v37 = vpop.f32.mrb[34].mxu1 }
0x10d7   : > { %v2342_v38 = vadd.f32 %v2334_v32, %v3504_v36  ;;  %v2337_v26 = vadd.f32 %v2884_v37, %v2670_v29  ;;  %v2328_v40 = vpop.f32.mrb[35].mxu1 }
0x10d8   : > { %v2340_v41 = vadd.f32 %v2326_v35, %v3499_v33  ;;  %v2329_v42 = vadd.f32 %v2670_v29, %v2328_v40 }
0x10d9   : > { %v2343_v44 = vadd.f32 %v2337_v26, %v3515_v30  ;;  %2350 = vst.msk [vmem:[%s3637_s15 + $0x10] sm:$0xff] (!%p2679_p6), %vm739_vm4, %v2342_v38 }
0x10da   : > { %v2341_v47 = vadd.f32 %v2329_v42, %v3509_v39  ;;  %2348 = vst.msk [vmem:[%s3637_s15] sm:$0xff] (!%p2679_p6), %vm739_vm4, %v2340_v41 }
0x10db   : > { %2351 = vst.msk [vmem:[%s3637_s15 + $0x18] sm:$0xff] %vm739_vm4, %v2343_v44 }
0x10dc   : > { %2349 = vst.msk [vmem:[%s3637_s15 + $0x8] sm:$0xff] %vm739_vm4, %v2341_v47 }
0x10dd PF: > { %p2680_p7 = scmp.ne.s32.totalorder %s3054_s18, 1 }
0x10de   : > { %v2358_v33 = vsel (!%p2680_p7), %vm739_vm4, %v2340_v41, 0.0  ;;  %v2364_v36 = vsel (!%p2680_p7), %vm739_vm4, %v2342_v38, 0.0  ;;  %v2361_v39 = vsel (!%p2680_p7), %vm739_vm4, %v2341_v47, 0.0  ;;  %v2367_v30 = vsel (!%p2680_p7), %vm739_vm4, %v2343_v44, 0.0  ;;  %s3659_s16 = sld [smem:[#allocation11_spill]] (!%p2680_p7)  ;;  %s3660_s21 = sld [smem:[#allocation12_spill]] (!%p2680_p7) }
0x10df   : > { %2355 = sbr.rel (%p2680_p7) target bundleno = 4640 (0x1220), region = 92  ;;  %2359 = vadd.xlane.f32.xlu0 (!%p2680_p7), %v2358_v33  ;;  %2365 = vadd.xlane.f32.xlu1 (!%p2680_p7), %v2364_v36 }
0x10e3   : > { %2362 = vadd.xlane.f32.xlu0 (!%p2680_p7), %v2361_v39  ;;  %2368 = vadd.xlane.f32.xlu1 (!%p2680_p7), %v2367_v30 }
0x10e4   : > { %v2681_v12 = vld [vmem:[%s3659_s16] ss:$0 sm:$0xff] (!%p2680_p7) }
0x10e5   : > { %v2682_v14 = vld [vmem:[%s3660_s21] ss:$0 sm:$0xff] (!%p2680_p7) }
0x116c   : > { %v2360_v49 = vpop.xlane.xlu0 %2359  ;;  %v2366_v50 = vpop.xlane.xlu1 %2365 }
0x116d   : > { %v2370_v51 = vmul.f32 0.03125, %v2360_v49  ;;  %v2372_v52 = vmul.f32 0.03125, %v2366_v50 }
0x116f   : > { %v2374_v54 = vsub.f32 %v2340_v41, %v2370_v51  ;;  %v2376_v56 = vsub.f32 %v2342_v38, %v2372_v52 }
0x1170   : > { %v2363_v57 = vpop.xlane.xlu0 %2362  ;;  %v2369_v19 = vpop.xlane.xlu1 %2368 }
0x1171   : > { %v2371_v20 = vmul.f32 0.03125, %v2363_v57  ;;  %v2373_v58 = vmul.f32 0.03125, %v2369_v19  ;;  %v2378_v59 = vmul.f32 %v2374_v54, %v2374_v54  ;;  %v2380_v43 = vmul.f32 %v2376_v56, %v2376_v56 }
0x1173   : > { %v2375_v45 = vsub.f32 %v2341_v47, %v2371_v20  ;;  %v2377_v46 = vsub.f32 %v2343_v44, %v2373_v58  ;;  %v2382_v60 = vsel %vm739_vm4, %v2378_v59, 0.0  ;;  %v2388_v61 = vsel %vm739_vm4, %v2380_v43, 0.0 }
0x1174   : > { %2383 = vadd.xlane.f32.xlu0 %v2382_v60 }
0x1175   : > { %v2379_v48 = vmul.f32 %v2375_v45, %v2375_v45  ;;  %v2381_v53 = vmul.f32 %v2377_v46, %v2377_v46 }
0x1177   : > { %v2385_v55 = vsel %vm739_vm4, %v2379_v48, 0.0  ;;  %v2391_v62 = vsel %vm739_vm4, %v2381_v53, 0.0 }
0x1178   : > { %2389 = vadd.xlane.f32.xlu0 %v2388_v61  ;;  %2386 = vadd.xlane.f32.xlu1 %v2385_v55 }
0x117c   : > { %2392 = vadd.xlane.f32.xlu1 %v2391_v62 }
0x1201   : > { %v2384_v63 = vpop.xlane.xlu0 %2383 }
0x1202   : > { %v2394_v0 = vmul.f32 0.03125, %v2384_v63 }
0x1204   : > { %v2398_v1 = vadd.f32 1e-05, %v2394_v0 }
0x1205   : > { %v2387_v2 = vpop.xlane.xlu1 %2386  ;;  %v2390_v3 = vpop.xlane.xlu0 %2389 }
0x1206   : > { %3032 = vrsqrt.f32 %v2398_v1  ;;  %v2395_v4 = vmul.f32 0.03125, %v2387_v2  ;;  %v2396_v5 = vmul.f32 0.03125, %v2390_v3 }
0x1208   : > { %v2399_v6 = vadd.f32 1e-05, %v2395_v4  ;;  %v2400_v7 = vadd.f32 1e-05, %v2396_v5 }
0x1209   : > { %v2393_v8 = vpop.xlane.xlu1 %2392 }
0x120a   : > { %3034 = vrsqrt.f32 %v2399_v6  ;;  %v2397_v10 = vmul.f32 0.03125, %v2393_v8 }
0x120b   : > { %3036 = vrsqrt.f32 %v2400_v7 }
0x120c   : > { %v2401_v11 = vadd.f32 1e-05, %v2397_v10 }
0x120e   : > { %3038 = vrsqrt.f32 %v2401_v11 }
0x1210   : > { %v3033_v9 = vpop.eup %3032 }
0x1211   : > { %v2406_v13 = vmul.f32 %v3033_v9, %v2374_v54 }
0x1213   : > { %v2416_v15 = vmul.f32 %v2681_v12, %v2406_v13 }
0x1214   : > { %v3035_v16 = vpop.eup %3034 }
0x1215   : > { %v3037_v17 = vpop.eup %3036  ;;  %v2426_v18 = vadd.f32 %v2682_v14, %v2416_v15  ;;  %v2407_v21 = vmul.f32 %v3035_v16, %v2375_v45 }
0x1216   : > { %v2408_v22 = vmul.f32 %v3037_v17, %v2376_v56 }
0x1217   : > { %2430 = vst.msk [vmem:[%s3637_s15] sm:$0xff] %vm739_vm4, %v2426_v18  ;;  %v2417_v23 = vmul.f32 %v2681_v12, %v2407_v21 }
0x1218   : > { %v3039_v24 = vpop.eup %3038  ;;  %v2418_v25 = vmul.f32 %v2681_v12, %v2408_v22 }
0x1219   : > { %v2427_v27 = vadd.f32 %v2682_v14, %v2417_v23  ;;  %v2409_v28 = vmul.f32 %v3039_v24, %v2377_v46 }
0x121a   : > { %v2428_v29 = vadd.f32 %v2682_v14, %v2418_v25 }
0x121b   : > { %2431 = vst.msk [vmem:[%s3637_s15 + $0x8] sm:$0xff] %vm739_vm4, %v2427_v27  ;;  %v2419_v31 = vmul.f32 %v2681_v12, %v2409_v28 }
0x121c   : > { %2432 = vst.msk [vmem:[%s3637_s15 + $0x10] sm:$0xff] %vm739_vm4, %v2428_v29 }
0x121d   : > { %v2429_v32 = vadd.f32 %v2682_v14, %v2419_v31 }
0x121f   : > { %2433 = vst.msk [vmem:[%s3637_s15 + $0x18] sm:$0xff] %vm739_vm4, %v2429_v32 }
0x1220 PF: > { %s3661_s19 = sld [smem:[#allocation5_spill]]  ;;  %s3662_s18 = sld [smem:[#allocation4_spill]] }
0x1226   : > { %s25_s20 = sadd.s32 1, %s3661_s19   ;;  %s3663_s19 = sld [smem:[#allocation6_spill]] }
0x1227   : > { %p22_p8 = scmp.ge.s32.totalorder %s25_s20, 4  }
0x1229   :  { %24 = sbr.rel (!%p22_p8) target bundleno = 6 (0x6), region = 158 }

</bundles_post_ra>
